<compile_context>
chip_gen: v6e
topology: v6e:2x2x1
jax: 0.10.0
libtpu: 0.0.40
codegen_flags: <defaults>
</compile_context>

<pallas_src>
from functools import partial

import numpy as np
import jax
import jax.numpy as jnp
from jax.experimental import pallas as pl
from jax.experimental.pallas import tpu as pltpu


def _round_up(x, m):
    return (x + m - 1) // m * m


def _device_kind():
    try:
        return jax.devices()[0].device_kind.lower()
    except Exception:
        return ""


def _lstm_proj_kernel(x_ref,        # [Tc, Bb, Dp]   bf16 time-major input chunk
                      m_ref,        # [Tc, Bb, 1]    f32 validity mask chunk
                      wih_ref,      # [Dp, 4*Hp]     bf16 W_ih^T, gate-aligned
                      whh_ref,      # [Hp, 4*Hp]     bf16 W_hh^T, gate-aligned
                      bias_ref,     # [1, 4*Hp]      f32 b_ih + b_hh, gate-aligned
                      wp_ref,       # [Hp, Dp]       bf16 W_proj^T
                      bp_ref,       # [1, Dp]        f32 b_proj
                      out_ref,      # [Tc, Bb, Dp]   f32
                      h_ref,        # VMEM scratch [Bb, Hp] f32 (carried over time chunks)
                      c_ref,        # VMEM scratch [Bb, Hp] f32
                      xg_ref,       # VMEM scratch [Tc, Bb, 4*Hp] bf16
                      *, gate_dtype, sub_block):
    ti = pl.program_id(1)
    Tc, Bb, Dp = x_ref.shape
    Hp = whh_ref.shape[0]
    f32 = jnp.float32
    bf16 = jnp.bfloat16

    # Reset the carried LSTM state at the start of each batch block's time sweep.
    @pl.when(ti == 0)
    def _():
        h_ref[...] = jnp.zeros_like(h_ref)
        c_ref[...] = jnp.zeros_like(c_ref)

    # Input-gate contribution for the whole chunk in one MXU matmul
    # (bf16 operands, f32 accumulate), stored to scratch in bf16.
    x2d = x_ref[...].reshape(Tc * Bb, Dp)
    xg = jnp.dot(x2d, wih_ref[...], preferred_element_type=f32) + bias_ref[...]
    xg_ref[...] = xg.reshape(Tc, Bb, 4 * Hp).astype(xg_ref.dtype)

    # Hoist loop-invariant operands.
    whh_b = whh_ref[...]                      # bf16 [Hp, 4Hp]
    wp_b = wp_ref[...]                        # bf16 [Hp, Dp]
    bp = bp_ref[...]                          # f32  [1, Dp]
    m_all = m_ref[...]                        # f32  [Tc, Bb, 1]  (one dense load)

    h = h_ref[...]                            # f32 [Bb, Hp]
    c = c_ref[...]                            # f32 [Bb, Hp]

    n_sub = Tc // sub_block
    for sb in range(n_sub):
        hs = []
        for k in range(sub_block):
            t = sb * sub_block + k
            # Recurrent matmul: bf16 operands, f32 accumulate.
            gates = xg_ref[t].astype(f32) + jnp.dot(
                h.astype(bf16), whh_b, preferred_element_type=f32)
            g = gates.astype(gate_dtype)      # bf16 nonlinearities on v6e/v7x
            i_g = jax.nn.sigmoid(g[:, 0 * Hp:1 * Hp])
            f_g = jax.nn.sigmoid(g[:, 1 * Hp:2 * Hp])
            g_g = jnp.tanh(g[:, 2 * Hp:3 * Hp])
            o_g = jax.nn.sigmoid(g[:, 3 * Hp:4 * Hp])
            # Cell-state accumulation stays in f32.
            c_new = f_g.astype(f32) * c + (i_g * g_g).astype(f32)
            h_new = (o_g * jnp.tanh(c_new.astype(gate_dtype))).astype(f32)

            m_t = m_all[t]                    # [Bb, 1] in {0., 1.}
            # Packed-sequence semantics: padded steps freeze the state and
            # produce zero hidden outputs (projection -> bias only there).
            h = h + m_t * (h_new - h)
            c = c + m_t * (c_new - c)
            hs.append((m_t * h_new).astype(bf16))

        # Sub-block projection on the MXU; overlaps with the next sub-block's
        # EUP-bound recurrence and avoids a full-chunk hseq scratch buffer.
        hstack = jnp.stack(hs, axis=0).reshape(sub_block * Bb, Hp)
        proj = jnp.dot(hstack, wp_b, preferred_element_type=f32) + bp
        out_ref[pl.ds(sb * sub_block, sub_block), :, :] = (
            proj.reshape(sub_block, Bb, Dp).astype(out_ref.dtype))

    h_ref[...] = h
    c_ref[...] = c


def _vmem_tile_bytes(shape, itemsize):
    s = list(shape)
    s[-1] = _round_up(s[-1], 128)
    if len(s) >= 2:
        s[-2] = _round_up(s[-2], 8)
    n = 1
    for d in s:
        n *= d
    return n * itemsize


def _const_spec(shape):
    idx = lambda bi, ti, _n=len(shape): (0,) * _n
    if hasattr(pl, "Buffered"):
        try:
            # Constant index_map -> fetched once; don't waste VMEM double-buffering.
            return pl.BlockSpec(shape, idx, pipeline_mode=pl.Buffered(1))
        except TypeError:
            pass
    return pl.BlockSpec(shape, idx)


def rnn_layers_forward(data, non_pad_mask, params, *, time_chunk=16, batch_block=None):
    """data: [B, T, d_model] f32, non_pad_mask: [B, T, 1] f32 (1=valid, 0=pad).

    Returns the full [B, T, d_model] output (padded positions = projection
    bias, matching pack_padded -> LSTM -> pad_packed -> Linear up to the
    max-length trim). Jit-compatible: no host syncs.
    """
    B, T, D = data.shape
    W_ih, W_hh, b_ih, b_hh, W_proj, b_proj = (
        params["W_ih"], params["W_hh"], params["b_ih"], params["b_hh"],
        params["W_proj"], params["b_proj"],
    )
    H = W_hh.shape[1]

    # ---- per-generation knobs (trace-time, host-side) ------------------------
    kind = _device_kind()
    is_v6 = "v6" in kind
    is_v7 = ("v7" in kind) or ("7x" in kind)
    gate_dtype = jnp.bfloat16 if (is_v6 or is_v7) else jnp.float32
    vmem_ceiling = (56 if is_v7 else 100) * 1024 * 1024
    if batch_block is None:
        batch_block = 256 if (is_v6 and B >= 256) else 128

    # ---- static tiling / padding decisions (Python ints) ---------------------
    Hp = _round_up(H, 128)            # lane-aligned gate width
    Dp = _round_up(D, 128)            # lane-dense input / output feature dim
    time_chunk = _round_up(min(max(time_chunk, 8), 32), 8)
    Tc = min(time_chunk, _round_up(T, 8))
    Tp = _round_up(T, Tc)
    SB = min(8, Tc)                   # projection sub-block (Tc is a multiple of 8)

    batch_block = _round_up(max(batch_block, 8), 8)
    Bb = min(batch_block, _round_up(B, 8))
    # v7x megacore: make sure the "parallel" batch axis has >= 2 blocks.
    if is_v7 and B > 8 and _round_up(B, Bb) // Bb < 2:
        Bb = _round_up(-(-B // 2), 8)
    Bp = _round_up(B, Bb)

    f32 = jnp.float32
    bf16 = jnp.bfloat16

    # ---- gate-aligned, zero-padded parameter packing (plain JAX glue) --------
    def gate_pack_T(W, in_dim, in_pad):
        # W: [4H, in_dim] (PyTorch i,f,g,o order) -> [in_pad, 4*Hp] transposed,
        # gate k occupying lanes [k*Hp, k*Hp+H). Packed in bf16 for the MXU.
        out = jnp.zeros((in_pad, 4 * Hp), f32)
        for k in range(4):
            out = out.at[:in_dim, k * Hp:k * Hp + H].set(
                jnp.asarray(W[k * H:(k + 1) * H, :], f32).T)
        return out.astype(bf16)

    wih_t = gate_pack_T(W_ih, D, Dp)                       # [Dp, 4Hp] bf16
    whh_t = gate_pack_T(W_hh, H, Hp)                       # [Hp, 4Hp] bf16
    bsum = jnp.asarray(b_ih + b_hh, f32)
    bias = jnp.zeros((1, 4 * Hp), f32)
    for k in range(4):
        bias = bias.at[0, k * Hp:k * Hp + H].set(bsum[k * H:(k + 1) * H])
    wproj_t = (jnp.zeros((Hp, Dp), f32)
               .at[:H, :D].set(jnp.asarray(W_proj, f32).T).astype(bf16))
    bproj = jnp.zeros((1, Dp), f32).at[0, :D].set(jnp.asarray(b_proj, f32))

    # ---- time-major, padded activations (bf16 input halves the DMA bytes) ----
    x_tm = jnp.zeros((Tp, Bp, Dp), bf16).at[:T, :B, :D].set(
        jnp.transpose(jnp.asarray(data, f32), (1, 0, 2)).astype(bf16))
    m_tm = jnp.zeros((Tp, Bp, 1), f32).at[:T, :B, :].set(
        jnp.transpose(jnp.asarray(non_pad_mask, f32), (1, 0, 2)))

    grid = (Bp // Bb, Tp // Tc)   # (batch blocks [parallel], time chunks [arbitrary])

    # ---- explicit VMEM budget -------------------------------------------------
    est = 0
    est += 2 * _vmem_tile_bytes((Tc, Bb, Dp), 2)           # x (bf16, double-buffered)
    est += 2 * _vmem_tile_bytes((Tc, Bb, 1), 4)            # mask
    est += 2 * _vmem_tile_bytes((Tc, Bb, Dp), 4)           # out (f32)
    est += (_vmem_tile_bytes((Dp, 4 * Hp), 2) + _vmem_tile_bytes((Hp, 4 * Hp), 2)
            + _vmem_tile_bytes((1, 4 * Hp), 4) + _vmem_tile_bytes((Hp, Dp), 2)
            + _vmem_tile_bytes((1, Dp), 4))                # weights (single-buffered)
    est += 2 * _vmem_tile_bytes((Bb, Hp), 4)               # h, c carry
    est += _vmem_tile_bytes((Tc, Bb, 4 * Hp), 2)           # xg scratch (bf16)
    vmem_limit = int(min(vmem_ceiling, max(32 * 1024 * 1024, int(est * 1.5) + (4 << 20))))

    kernel = partial(_lstm_proj_kernel, gate_dtype=gate_dtype, sub_block=SB)

    out_tm = pl.pallas_call(
        kernel,
        out_shape=jax.ShapeDtypeStruct((Tp, Bp, Dp), f32),
        grid_spec=pltpu.PrefetchScalarGridSpec(
            num_scalar_prefetch=0,
            grid=grid,
            in_specs=[
                pl.BlockSpec((Tc, Bb, Dp), lambda bi, ti: (ti, bi, 0)),   # x
                pl.BlockSpec((Tc, Bb, 1), lambda bi, ti: (ti, bi, 0)),    # mask
                _const_spec((Dp, 4 * Hp)),                                # W_ih^T
                _const_spec((Hp, 4 * Hp)),                                # W_hh^T
                _const_spec((1, 4 * Hp)),                                 # bias
                _const_spec((Hp, Dp)),                                    # W_proj^T
                _const_spec((1, Dp)),                                     # b_proj
            ],
            out_specs=pl.BlockSpec((Tc, Bb, Dp), lambda bi, ti: (ti, bi, 0)),
            scratch_shapes=[
                pltpu.VMEM((Bb, Hp), f32),                # h carry
                pltpu.VMEM((Bb, Hp), f32),                # c carry
                pltpu.VMEM((Tc, Bb, 4 * Hp), bf16),       # per-chunk input gates
            ],
        ),
        compiler_params=pltpu.CompilerParams(
            dimension_semantics=("parallel", "arbitrary"),
            vmem_limit_bytes=vmem_limit),
    )(x_tm, m_tm, wih_t, whh_t, bias, wproj_t, bproj)

    # Back to batch-major, drop padding.
    return jnp.transpose(out_tm[:T, :B, :D], (1, 0, 2))


# ---------------------------------------------------------------------------
# Pure numpy reference (mirrors torch pack -> LSTM -> pad -> Linear)
# ---------------------------------------------------------------------------
def _ref_forward(x, lengths, W_ih, W_hh, b_ih, b_hh, W_proj, b_proj):
    def sigmoid(v):
        return 1.0 / (1.0 + np.exp(-v))

    B, T, D = x.shape
    H = W_hh.shape[1]
    t_out = int(np.max(lengths))
    out_h = np.zeros((B, t_out, H), np.float32)
    for b in range(B):
        h = np.zeros(H, np.float32)
        c = np.zeros(H, np.float32)
        for t in range(int(lengths[b])):
            g = W_ih @ x[b, t] + b_ih + W_hh @ h + b_hh
            i = sigmoid(g[0:H])
            f = sigmoid(g[H:2 * H])
            gg = np.tanh(g[2 * H:3 * H])
            o = sigmoid(g[3 * H:4 * H])
            c = f * c + i * gg
            h = o * np.tanh(c)
            out_h[b, t] = h
    return out_h @ W_proj.T + b_proj[None, None, :]


if __name__ == "__main__":
    B, T, d_model, d_rnn = 2, 8, 32, 32
    H = d_rnn

    key = jax.random.PRNGKey(0)
    keys = jax.random.split(key, 8)
    scale = 1.0 / np.sqrt(d_rnn)

    params = {
        "W_ih": jax.random.uniform(keys[0], (4 * H, d_model), jnp.float32, -scale, scale),
        "W_hh": jax.random.uniform(keys[1], (4 * H, H), jnp.float32, -scale, scale),
        "b_ih": jax.random.uniform(keys[2], (4 * H,), jnp.float32, -scale, scale),
        "b_hh": jax.random.uniform(keys[3], (4 * H,), jnp.float32, -scale, scale),
        "W_proj": jax.random.uniform(keys[4], (d_model, H), jnp.float32, -scale, scale),
        "b_proj": jax.random.uniform(keys[5], (d_model,), jnp.float32, -scale, scale),
    }

    data = jax.random.normal(keys[6], (B, T, d_model), jnp.float32)
    lengths_np = np.array([T, 5], np.int32)
    mask_np = (np.arange(T)[None, :] < lengths_np[:, None]).astype(np.float32)
    non_pad_mask = jnp.asarray(mask_np[:, :, None])  # [B, T, 1]

    fwd = jax.jit(lambda d, m: rnn_layers_forward(d, m, params))
    out = jax.block_until_ready(fwd(data, non_pad_mask))

    ref = _ref_forward(
        np.asarray(data), lengths_np,
        np.asarray(params["W_ih"]), np.asarray(params["W_hh"]),
        np.asarray(params["b_ih"]), np.asarray(params["b_hh"]),
        np.asarray(params["W_proj"]), np.asarray(params["b_proj"]),
    )  # [B, max_len, D]; here max(lengths) == T so shapes match directly.

    # bf16 MXU operands / bf16 gate nonlinearities -> looser tolerance than pure f32.
    np.testing.assert_allclose(np.asarray(out), ref, rtol=5e-2, atol=5e-2)
    print("KERNEL_OK")
</pallas_src>

<mosaic_0001>
module attributes {stable_mosaic.version = 11 : i64} {
  func.func @_lstm_proj_kernel(%arg0: i32, %arg1: i32, %arg2: memref<8x8x128xbf16, #tpu.memory_space<vmem>>, %arg3: memref<8x8x1xf32, #tpu.memory_space<vmem>>, %arg4: memref<128x512xbf16, #tpu.memory_space<vmem>>, %arg5: memref<128x512xbf16, #tpu.memory_space<vmem>>, %arg6: memref<1x512xf32, #tpu.memory_space<vmem>>, %arg7: memref<128x128xbf16, #tpu.memory_space<vmem>>, %arg8: memref<1x128xf32, #tpu.memory_space<vmem>>, %arg9: memref<8x8x128xf32, #tpu.memory_space<vmem>>, %arg10: memref<8x128xf32, #tpu.memory_space<vmem>>, %arg11: memref<8x128xf32, #tpu.memory_space<vmem>>, %arg12: memref<8x8x512xbf16, #tpu.memory_space<vmem>>) attributes {dimension_semantics = [#tpu.dimension_semantics<parallel>, #tpu.dimension_semantics<arbitrary>], iteration_bounds = array<i64: 1, 1>, scalar_prefetch = 0 : i64, scratch_operands = 3 : i64, tpu.core_type = #tpu.core_type<tc>, window_params = [{transform_indices = @transform_0, window_bounds = array<i64: 8, 8, 128>}, {transform_indices = @transform_1, window_bounds = array<i64: 8, 8, 1>}, {pipeline_mode = #tpu.pipeline_mode<synchronous>, transform_indices = @transform_2, window_bounds = array<i64: 128, 512>}, {pipeline_mode = #tpu.pipeline_mode<synchronous>, transform_indices = @transform_3, window_bounds = array<i64: 128, 512>}, {pipeline_mode = #tpu.pipeline_mode<synchronous>, transform_indices = @transform_4, window_bounds = array<i64: 1, 512>}, {pipeline_mode = #tpu.pipeline_mode<synchronous>, transform_indices = @transform_5, window_bounds = array<i64: 128, 128>}, {pipeline_mode = #tpu.pipeline_mode<synchronous>, transform_indices = @transform_6, window_bounds = array<i64: 1, 128>}, {transform_indices = @transform_7, window_bounds = array<i64: 8, 8, 128>}]} {
    %c0_i32 = arith.constant 0 : i32
    %0 = arith.cmpi eq, %arg1, %c0_i32 : i32
    %1 = arith.extui %0 : i1 to i32
    %c0_i32_0 = arith.constant 0 : i32
    %2 = arith.cmpi ne, %1, %c0_i32_0 : i32
    scf.if %2 {
      %cst_80 = arith.constant 0.000000e+00 : f32
      %388 = vector.broadcast %cst_80 : f32 to vector<8x128xf32>
      %c0_81 = arith.constant 0 : index
      %c0_82 = arith.constant 0 : index
      %389 = vector.load %arg10[%c0_81, %c0_82] : memref<8x128xf32, #tpu.memory_space<vmem>>, vector<8x128xf32>
      tpu.vector_store %arg10[%c0_81, %c0_82], %388 {strides = array<i32>} : memref<8x128xf32, #tpu.memory_space<vmem>>, vector<8x128xf32>,
      %cst_83 = arith.constant 0.000000e+00 : f32
      %390 = vector.broadcast %cst_83 : f32 to vector<8x128xf32>
      %c0_84 = arith.constant 0 : index
      %c0_85 = arith.constant 0 : index
      %391 = vector.load %arg11[%c0_84, %c0_85] : memref<8x128xf32, #tpu.memory_space<vmem>>, vector<8x128xf32>
      tpu.vector_store %arg11[%c0_84, %c0_85], %390 {strides = array<i32>} : memref<8x128xf32, #tpu.memory_space<vmem>>, vector<8x128xf32>,
    } else {
    }
    %c0 = arith.constant 0 : index
    %c0_1 = arith.constant 0 : index
    %c0_2 = arith.constant 0 : index
    %3 = vector.load %arg2[%c0, %c0_1, %c0_2] : memref<8x8x128xbf16, #tpu.memory_space<vmem>>, vector<8x8x128xbf16>
    %4 = vector.shape_cast %3 : vector<8x8x128xbf16> to vector<64x128xbf16>
    %c0_3 = arith.constant 0 : index
    %c0_4 = arith.constant 0 : index
    %5 = vector.load %arg4[%c0_3, %c0_4] : memref<128x512xbf16, #tpu.memory_space<vmem>>, vector<128x512xbf16>
    %cst = arith.constant dense<0.000000e+00> : vector<64x512xf32>
    %6 = tpu.matmul %4, %5, %cst {dimension_numbers = #tpu.dot_dimension_numbers<[1], [0], [0], [1], [0, 0, 1, 1], [], []>} : vector<64x128xbf16>, vector<128x512xbf16>, vector<64x512xf32> -> vector<64x512xf32>
    %c0_5 = arith.constant 0 : index
    %c0_6 = arith.constant 0 : index
    %7 = vector.load %arg6[%c0_5, %c0_6] : memref<1x512xf32, #tpu.memory_space<vmem>>, vector<1x512xf32>
    %8 = vector.broadcast %7 : vector<1x512xf32> to vector<64x512xf32>
    %9 = arith.addf %6, %8 : vector<64x512xf32>
    %10 = vector.shape_cast %9 : vector<64x512xf32> to vector<8x8x512xf32>
    %11 = arith.truncf %10 : vector<8x8x512xf32> to vector<8x8x512xbf16>
    %c0_7 = arith.constant 0 : index
    %c0_8 = arith.constant 0 : index
    %c0_9 = arith.constant 0 : index
    %12 = vector.load %arg12[%c0_7, %c0_8, %c0_9] : memref<8x8x512xbf16, #tpu.memory_space<vmem>>, vector<8x8x512xbf16>
    tpu.vector_store %arg12[%c0_7, %c0_8, %c0_9], %11 {strides = array<i32>} : memref<8x8x512xbf16, #tpu.memory_space<vmem>>, vector<8x8x512xbf16>,
    %c0_10 = arith.constant 0 : index
    %c0_11 = arith.constant 0 : index
    %13 = vector.load %arg5[%c0_10, %c0_11] : memref<128x512xbf16, #tpu.memory_space<vmem>>, vector<128x512xbf16>
    %c0_12 = arith.constant 0 : index
    %c0_13 = arith.constant 0 : index
    %14 = vector.load %arg7[%c0_12, %c0_13] : memref<128x128xbf16, #tpu.memory_space<vmem>>, vector<128x128xbf16>
    %c0_14 = arith.constant 0 : index
    %c0_15 = arith.constant 0 : index
    %15 = vector.load %arg8[%c0_14, %c0_15] : memref<1x128xf32, #tpu.memory_space<vmem>>, vector<1x128xf32>
    %c0_16 = arith.constant 0 : index
    %c0_17 = arith.constant 0 : index
    %c0_18 = arith.constant 0 : index
    %16 = vector.load %arg3[%c0_16, %c0_17, %c0_18] : memref<8x8x1xf32, #tpu.memory_space<vmem>>, vector<8x8x1xf32>
    %c0_19 = arith.constant 0 : index
    %c0_20 = arith.constant 0 : index
    %17 = vector.load %arg10[%c0_19, %c0_20] : memref<8x128xf32, #tpu.memory_space<vmem>>, vector<8x128xf32>
    %c0_21 = arith.constant 0 : index
    %c0_22 = arith.constant 0 : index
    %18 = vector.load %arg11[%c0_21, %c0_22] : memref<8x128xf32, #tpu.memory_space<vmem>>, vector<8x128xf32>
    %c0_23 = arith.constant 0 : index
    %c0_24 = arith.constant 0 : index
    %c0_25 = arith.constant 0 : index
    %19 = vector.load %arg12[%c0_23, %c0_24, %c0_25] : memref<8x8x512xbf16, #tpu.memory_space<vmem>>, vector<1x8x512xbf16>
    %20 = vector.shape_cast %19 : vector<1x8x512xbf16> to vector<8x512xbf16>
    %21 = arith.extf %20 : vector<8x512xbf16> to vector<8x512xf32>
    %22 = arith.truncf %17 : vector<8x128xf32> to vector<8x128xbf16>
    %cst_26 = arith.constant dense<0.000000e+00> : vector<8x512xf32>
    %23 = tpu.matmul %22, %13, %cst_26 {dimension_numbers = #tpu.dot_dimension_numbers<[1], [0], [0], [1], [0, 0, 1, 1], [], []>} : vector<8x128xbf16>, vector<128x512xbf16>, vector<8x512xf32> -> vector<8x512xf32>
    %24 = arith.addf %21, %23 : vector<8x512xf32>
    %25 = vector.extract_strided_slice %24 {offsets = [0, 0], sizes = [8, 128], strides = [1, 1]} : vector<8x512xf32> to vector<8x128xf32>
    %26 = arith.negf %25 : vector<8x128xf32>
    %27 = math.exp %26 : vector<8x128xf32>
    %cst_27 = arith.constant 1.000000e+00 : f32
    %28 = vector.broadcast %cst_27 : f32 to vector<8x128xf32>
    %29 = arith.addf %28, %27 : vector<8x128xf32>
    %30 = arith.divf %28, %29 : vector<8x128xf32>
    %31 = vector.extract_strided_slice %24 {offsets = [0, 128], sizes = [8, 128], strides = [1, 1]} : vector<8x512xf32> to vector<8x128xf32>
    %32 = arith.negf %31 : vector<8x128xf32>
    %33 = math.exp %32 : vector<8x128xf32>
    %cst_28 = arith.constant 1.000000e+00 : f32
    %34 = vector.broadcast %cst_28 : f32 to vector<8x128xf32>
    %35 = arith.addf %34, %33 : vector<8x128xf32>
    %36 = arith.divf %34, %35 : vector<8x128xf32>
    %37 = vector.extract_strided_slice %24 {offsets = [0, 256], sizes = [8, 128], strides = [1, 1]} : vector<8x512xf32> to vector<8x128xf32>
    %38 = math.tanh %37 : vector<8x128xf32>
    %39 = vector.extract_strided_slice %24 {offsets = [0, 384], sizes = [8, 128], strides = [1, 1]} : vector<8x512xf32> to vector<8x128xf32>
    %40 = arith.negf %39 : vector<8x128xf32>
    %41 = math.exp %40 : vector<8x128xf32>
    %cst_29 = arith.constant 1.000000e+00 : f32
    %42 = vector.broadcast %cst_29 : f32 to vector<8x128xf32>
    %43 = arith.addf %42, %41 : vector<8x128xf32>
    %44 = arith.divf %42, %43 : vector<8x128xf32>
    %45 = arith.mulf %36, %18 : vector<8x128xf32>
    %46 = arith.mulf %30, %38 : vector<8x128xf32>
    %47 = arith.addf %45, %46 : vector<8x128xf32>
    %48 = math.tanh %47 : vector<8x128xf32>
    %49 = arith.mulf %44, %48 : vector<8x128xf32>
    %50 = vector.extract_strided_slice %16 {offsets = [0, 0, 0], sizes = [1, 8, 1], strides = [1, 1, 1]} : vector<8x8x1xf32> to vector<1x8x1xf32>
    %51 = vector.shape_cast %50 : vector<1x8x1xf32> to vector<8x1xf32>
    %52 = arith.subf %49, %17 : vector<8x128xf32>
    %53 = vector.broadcast %51 : vector<8x1xf32> to vector<8x128xf32>
    %54 = arith.mulf %53, %52 : vector<8x128xf32>
    %55 = arith.addf %17, %54 : vector<8x128xf32>
    %56 = arith.subf %47, %18 : vector<8x128xf32>
    %57 = vector.broadcast %51 : vector<8x1xf32> to vector<8x128xf32>
    %58 = arith.mulf %57, %56 : vector<8x128xf32>
    %59 = arith.addf %18, %58 : vector<8x128xf32>
    %60 = vector.broadcast %51 : vector<8x1xf32> to vector<8x128xf32>
    %61 = arith.mulf %60, %49 : vector<8x128xf32>
    %62 = arith.truncf %61 : vector<8x128xf32> to vector<8x128xbf16>
    %c1 = arith.constant 1 : index
    %c0_30 = arith.constant 0 : index
    %c0_31 = arith.constant 0 : index
    %63 = vector.load %arg12[%c1, %c0_30, %c0_31] : memref<8x8x512xbf16, #tpu.memory_space<vmem>>, vector<1x8x512xbf16>
    %64 = vector.shape_cast %63 : vector<1x8x512xbf16> to vector<8x512xbf16>
    %65 = arith.extf %64 : vector<8x512xbf16> to vector<8x512xf32>
    %66 = arith.truncf %55 : vector<8x128xf32> to vector<8x128xbf16>
    %cst_32 = arith.constant dense<0.000000e+00> : vector<8x512xf32>
    %67 = tpu.matmul %66, %13, %cst_32 {dimension_numbers = #tpu.dot_dimension_numbers<[1], [0], [0], [1], [0, 0, 1, 1], [], []>} : vector<8x128xbf16>, vector<128x512xbf16>, vector<8x512xf32> -> vector<8x512xf32>
    %68 = arith.addf %65, %67 : vector<8x512xf32>
    %69 = vector.extract_strided_slice %68 {offsets = [0, 0], sizes = [8, 128], strides = [1, 1]} : vector<8x512xf32> to vector<8x128xf32>
    %70 = arith.negf %69 : vector<8x128xf32>
    %71 = math.exp %70 : vector<8x128xf32>
    %cst_33 = arith.constant 1.000000e+00 : f32
    %72 = vector.broadcast %cst_33 : f32 to vector<8x128xf32>
    %73 = arith.addf %72, %71 : vector<8x128xf32>
    %74 = arith.divf %72, %73 : vector<8x128xf32>
    %75 = vector.extract_strided_slice %68 {offsets = [0, 128], sizes = [8, 128], strides = [1, 1]} : vector<8x512xf32> to vector<8x128xf32>
    %76 = arith.negf %75 : vector<8x128xf32>
    %77 = math.exp %76 : vector<8x128xf32>
    %cst_34 = arith.constant 1.000000e+00 : f32
    %78 = vector.broadcast %cst_34 : f32 to vector<8x128xf32>
    %79 = arith.addf %78, %77 : vector<8x128xf32>
    %80 = arith.divf %78, %79 : vector<8x128xf32>
    %81 = vector.extract_strided_slice %68 {offsets = [0, 256], sizes = [8, 128], strides = [1, 1]} : vector<8x512xf32> to vector<8x128xf32>
    %82 = math.tanh %81 : vector<8x128xf32>
    %83 = vector.extract_strided_slice %68 {offsets = [0, 384], sizes = [8, 128], strides = [1, 1]} : vector<8x512xf32> to vector<8x128xf32>
    %84 = arith.negf %83 : vector<8x128xf32>
    %85 = math.exp %84 : vector<8x128xf32>
    %cst_35 = arith.constant 1.000000e+00 : f32
    %86 = vector.broadcast %cst_35 : f32 to vector<8x128xf32>
    %87 = arith.addf %86, %85 : vector<8x128xf32>
    %88 = arith.divf %86, %87 : vector<8x128xf32>
    %89 = arith.mulf %80, %59 : vector<8x128xf32>
    %90 = arith.mulf %74, %82 : vector<8x128xf32>
    %91 = arith.addf %89, %90 : vector<8x128xf32>
    %92 = math.tanh %91 : vector<8x128xf32>
    %93 = arith.mulf %88, %92 : vector<8x128xf32>
    %94 = vector.extract_strided_slice %16 {offsets = [1, 0, 0], sizes = [1, 8, 1], strides = [1, 1, 1]} : vector<8x8x1xf32> to vector<1x8x1xf32>
    %95 = vector.shape_cast %94 : vector<1x8x1xf32> to vector<8x1xf32>
    %96 = arith.subf %93, %55 : vector<8x128xf32>
    %97 = vector.broadcast %95 : vector<8x1xf32> to vector<8x128xf32>
    %98 = arith.mulf %97, %96 : vector<8x128xf32>
    %99 = arith.addf %55, %98 : vector<8x128xf32>
    %100 = arith.subf %91, %59 : vector<8x128xf32>
    %101 = vector.broadcast %95 : vector<8x1xf32> to vector<8x128xf32>
    %102 = arith.mulf %101, %100 : vector<8x128xf32>
    %103 = arith.addf %59, %102 : vector<8x128xf32>
    %104 = vector.broadcast %95 : vector<8x1xf32> to vector<8x128xf32>
    %105 = arith.mulf %104, %93 : vector<8x128xf32>
    %106 = arith.truncf %105 : vector<8x128xf32> to vector<8x128xbf16>
    %c2 = arith.constant 2 : index
    %c0_36 = arith.constant 0 : index
    %c0_37 = arith.constant 0 : index
    %107 = vector.load %arg12[%c2, %c0_36, %c0_37] : memref<8x8x512xbf16, #tpu.memory_space<vmem>>, vector<1x8x512xbf16>
    %108 = vector.shape_cast %107 : vector<1x8x512xbf16> to vector<8x512xbf16>
    %109 = arith.extf %108 : vector<8x512xbf16> to vector<8x512xf32>
    %110 = arith.truncf %99 : vector<8x128xf32> to vector<8x128xbf16>
    %cst_38 = arith.constant dense<0.000000e+00> : vector<8x512xf32>
    %111 = tpu.matmul %110, %13, %cst_38 {dimension_numbers = #tpu.dot_dimension_numbers<[1], [0], [0], [1], [0, 0, 1, 1], [], []>} : vector<8x128xbf16>, vector<128x512xbf16>, vector<8x512xf32> -> vector<8x512xf32>
    %112 = arith.addf %109, %111 : vector<8x512xf32>
    %113 = vector.extract_strided_slice %112 {offsets = [0, 0], sizes = [8, 128], strides = [1, 1]} : vector<8x512xf32> to vector<8x128xf32>
    %114 = arith.negf %113 : vector<8x128xf32>
    %115 = math.exp %114 : vector<8x128xf32>
    %cst_39 = arith.constant 1.000000e+00 : f32
    %116 = vector.broadcast %cst_39 : f32 to vector<8x128xf32>
    %117 = arith.addf %116, %115 : vector<8x128xf32>
    %118 = arith.divf %116, %117 : vector<8x128xf32>
    %119 = vector.extract_strided_slice %112 {offsets = [0, 128], sizes = [8, 128], strides = [1, 1]} : vector<8x512xf32> to vector<8x128xf32>
    %120 = arith.negf %119 : vector<8x128xf32>
    %121 = math.exp %120 : vector<8x128xf32>
    %cst_40 = arith.constant 1.000000e+00 : f32
    %122 = vector.broadcast %cst_40 : f32 to vector<8x128xf32>
    %123 = arith.addf %122, %121 : vector<8x128xf32>
    %124 = arith.divf %122, %123 : vector<8x128xf32>
    %125 = vector.extract_strided_slice %112 {offsets = [0, 256], sizes = [8, 128], strides = [1, 1]} : vector<8x512xf32> to vector<8x128xf32>
    %126 = math.tanh %125 : vector<8x128xf32>
    %127 = vector.extract_strided_slice %112 {offsets = [0, 384], sizes = [8, 128], strides = [1, 1]} : vector<8x512xf32> to vector<8x128xf32>
    %128 = arith.negf %127 : vector<8x128xf32>
    %129 = math.exp %128 : vector<8x128xf32>
    %cst_41 = arith.constant 1.000000e+00 : f32
    %130 = vector.broadcast %cst_41 : f32 to vector<8x128xf32>
    %131 = arith.addf %130, %129 : vector<8x128xf32>
    %132 = arith.divf %130, %131 : vector<8x128xf32>
    %133 = arith.mulf %124, %103 : vector<8x128xf32>
    %134 = arith.mulf %118, %126 : vector<8x128xf32>
    %135 = arith.addf %133, %134 : vector<8x128xf32>
    %136 = math.tanh %135 : vector<8x128xf32>
    %137 = arith.mulf %132, %136 : vector<8x128xf32>
    %138 = vector.extract_strided_slice %16 {offsets = [2, 0, 0], sizes = [1, 8, 1], strides = [1, 1, 1]} : vector<8x8x1xf32> to vector<1x8x1xf32>
    %139 = vector.shape_cast %138 : vector<1x8x1xf32> to vector<8x1xf32>
    %140 = arith.subf %137, %99 : vector<8x128xf32>
    %141 = vector.broadcast %139 : vector<8x1xf32> to vector<8x128xf32>
    %142 = arith.mulf %141, %140 : vector<8x128xf32>
    %143 = arith.addf %99, %142 : vector<8x128xf32>
    %144 = arith.subf %135, %103 : vector<8x128xf32>
    %145 = vector.broadcast %139 : vector<8x1xf32> to vector<8x128xf32>
    %146 = arith.mulf %145, %144 : vector<8x128xf32>
    %147 = arith.addf %103, %146 : vector<8x128xf32>
    %148 = vector.broadcast %139 : vector<8x1xf32> to vector<8x128xf32>
    %149 = arith.mulf %148, %137 : vector<8x128xf32>
    %150 = arith.truncf %149 : vector<8x128xf32> to vector<8x128xbf16>
    %c3 = arith.constant 3 : index
    %c0_42 = arith.constant 0 : index
    %c0_43 = arith.constant 0 : index
    %151 = vector.load %arg12[%c3, %c0_42, %c0_43] : memref<8x8x512xbf16, #tpu.memory_space<vmem>>, vector<1x8x512xbf16>
    %152 = vector.shape_cast %151 : vector<1x8x512xbf16> to vector<8x512xbf16>
    %153 = arith.extf %152 : vector<8x512xbf16> to vector<8x512xf32>
    %154 = arith.truncf %143 : vector<8x128xf32> to vector<8x128xbf16>
    %cst_44 = arith.constant dense<0.000000e+00> : vector<8x512xf32>
    %155 = tpu.matmul %154, %13, %cst_44 {dimension_numbers = #tpu.dot_dimension_numbers<[1], [0], [0], [1], [0, 0, 1, 1], [], []>} : vector<8x128xbf16>, vector<128x512xbf16>, vector<8x512xf32> -> vector<8x512xf32>
    %156 = arith.addf %153, %155 : vector<8x512xf32>
    %157 = vector.extract_strided_slice %156 {offsets = [0, 0], sizes = [8, 128], strides = [1, 1]} : vector<8x512xf32> to vector<8x128xf32>
    %158 = arith.negf %157 : vector<8x128xf32>
    %159 = math.exp %158 : vector<8x128xf32>
    %cst_45 = arith.constant 1.000000e+00 : f32
    %160 = vector.broadcast %cst_45 : f32 to vector<8x128xf32>
    %161 = arith.addf %160, %159 : vector<8x128xf32>
    %162 = arith.divf %160, %161 : vector<8x128xf32>
    %163 = vector.extract_strided_slice %156 {offsets = [0, 128], sizes = [8, 128], strides = [1, 1]} : vector<8x512xf32> to vector<8x128xf32>
    %164 = arith.negf %163 : vector<8x128xf32>
    %165 = math.exp %164 : vector<8x128xf32>
    %cst_46 = arith.constant 1.000000e+00 : f32
    %166 = vector.broadcast %cst_46 : f32 to vector<8x128xf32>
    %167 = arith.addf %166, %165 : vector<8x128xf32>
    %168 = arith.divf %166, %167 : vector<8x128xf32>
    %169 = vector.extract_strided_slice %156 {offsets = [0, 256], sizes = [8, 128], strides = [1, 1]} : vector<8x512xf32> to vector<8x128xf32>
    %170 = math.tanh %169 : vector<8x128xf32>
    %171 = vector.extract_strided_slice %156 {offsets = [0, 384], sizes = [8, 128], strides = [1, 1]} : vector<8x512xf32> to vector<8x128xf32>
    %172 = arith.negf %171 : vector<8x128xf32>
    %173 = math.exp %172 : vector<8x128xf32>
    %cst_47 = arith.constant 1.000000e+00 : f32
    %174 = vector.broadcast %cst_47 : f32 to vector<8x128xf32>
    %175 = arith.addf %174, %173 : vector<8x128xf32>
    %176 = arith.divf %174, %175 : vector<8x128xf32>
    %177 = arith.mulf %168, %147 : vector<8x128xf32>
    %178 = arith.mulf %162, %170 : vector<8x128xf32>
    %179 = arith.addf %177, %178 : vector<8x128xf32>
    %180 = math.tanh %179 : vector<8x128xf32>
    %181 = arith.mulf %176, %180 : vector<8x128xf32>
    %182 = vector.extract_strided_slice %16 {offsets = [3, 0, 0], sizes = [1, 8, 1], strides = [1, 1, 1]} : vector<8x8x1xf32> to vector<1x8x1xf32>
    %183 = vector.shape_cast %182 : vector<1x8x1xf32> to vector<8x1xf32>
    %184 = arith.subf %181, %143 : vector<8x128xf32>
    %185 = vector.broadcast %183 : vector<8x1xf32> to vector<8x128xf32>
    %186 = arith.mulf %185, %184 : vector<8x128xf32>
    %187 = arith.addf %143, %186 : vector<8x128xf32>
    %188 = arith.subf %179, %147 : vector<8x128xf32>
    %189 = vector.broadcast %183 : vector<8x1xf32> to vector<8x128xf32>
    %190 = arith.mulf %189, %188 : vector<8x128xf32>
    %191 = arith.addf %147, %190 : vector<8x128xf32>
    %192 = vector.broadcast %183 : vector<8x1xf32> to vector<8x128xf32>
    %193 = arith.mulf %192, %181 : vector<8x128xf32>
    %194 = arith.truncf %193 : vector<8x128xf32> to vector<8x128xbf16>
    %c4 = arith.constant 4 : index
    %c0_48 = arith.constant 0 : index
    %c0_49 = arith.constant 0 : index
    %195 = vector.load %arg12[%c4, %c0_48, %c0_49] : memref<8x8x512xbf16, #tpu.memory_space<vmem>>, vector<1x8x512xbf16>
    %196 = vector.shape_cast %195 : vector<1x8x512xbf16> to vector<8x512xbf16>
    %197 = arith.extf %196 : vector<8x512xbf16> to vector<8x512xf32>
    %198 = arith.truncf %187 : vector<8x128xf32> to vector<8x128xbf16>
    %cst_50 = arith.constant dense<0.000000e+00> : vector<8x512xf32>
    %199 = tpu.matmul %198, %13, %cst_50 {dimension_numbers = #tpu.dot_dimension_numbers<[1], [0], [0], [1], [0, 0, 1, 1], [], []>} : vector<8x128xbf16>, vector<128x512xbf16>, vector<8x512xf32> -> vector<8x512xf32>
    %200 = arith.addf %197, %199 : vector<8x512xf32>
    %201 = vector.extract_strided_slice %200 {offsets = [0, 0], sizes = [8, 128], strides = [1, 1]} : vector<8x512xf32> to vector<8x128xf32>
    %202 = arith.negf %201 : vector<8x128xf32>
    %203 = math.exp %202 : vector<8x128xf32>
    %cst_51 = arith.constant 1.000000e+00 : f32
    %204 = vector.broadcast %cst_51 : f32 to vector<8x128xf32>
    %205 = arith.addf %204, %203 : vector<8x128xf32>
    %206 = arith.divf %204, %205 : vector<8x128xf32>
    %207 = vector.extract_strided_slice %200 {offsets = [0, 128], sizes = [8, 128], strides = [1, 1]} : vector<8x512xf32> to vector<8x128xf32>
    %208 = arith.negf %207 : vector<8x128xf32>
    %209 = math.exp %208 : vector<8x128xf32>
    %cst_52 = arith.constant 1.000000e+00 : f32
    %210 = vector.broadcast %cst_52 : f32 to vector<8x128xf32>
    %211 = arith.addf %210, %209 : vector<8x128xf32>
    %212 = arith.divf %210, %211 : vector<8x128xf32>
    %213 = vector.extract_strided_slice %200 {offsets = [0, 256], sizes = [8, 128], strides = [1, 1]} : vector<8x512xf32> to vector<8x128xf32>
    %214 = math.tanh %213 : vector<8x128xf32>
    %215 = vector.extract_strided_slice %200 {offsets = [0, 384], sizes = [8, 128], strides = [1, 1]} : vector<8x512xf32> to vector<8x128xf32>
    %216 = arith.negf %215 : vector<8x128xf32>
    %217 = math.exp %216 : vector<8x128xf32>
    %cst_53 = arith.constant 1.000000e+00 : f32
    %218 = vector.broadcast %cst_53 : f32 to vector<8x128xf32>
    %219 = arith.addf %218, %217 : vector<8x128xf32>
    %220 = arith.divf %218, %219 : vector<8x128xf32>
    %221 = arith.mulf %212, %191 : vector<8x128xf32>
    %222 = arith.mulf %206, %214 : vector<8x128xf32>
    %223 = arith.addf %221, %222 : vector<8x128xf32>
    %224 = math.tanh %223 : vector<8x128xf32>
    %225 = arith.mulf %220, %224 : vector<8x128xf32>
    %226 = vector.extract_strided_slice %16 {offsets = [4, 0, 0], sizes = [1, 8, 1], strides = [1, 1, 1]} : vector<8x8x1xf32> to vector<1x8x1xf32>
    %227 = vector.shape_cast %226 : vector<1x8x1xf32> to vector<8x1xf32>
    %228 = arith.subf %225, %187 : vector<8x128xf32>
    %229 = vector.broadcast %227 : vector<8x1xf32> to vector<8x128xf32>
    %230 = arith.mulf %229, %228 : vector<8x128xf32>
    %231 = arith.addf %187, %230 : vector<8x128xf32>
    %232 = arith.subf %223, %191 : vector<8x128xf32>
    %233 = vector.broadcast %227 : vector<8x1xf32> to vector<8x128xf32>
    %234 = arith.mulf %233, %232 : vector<8x128xf32>
    %235 = arith.addf %191, %234 : vector<8x128xf32>
    %236 = vector.broadcast %227 : vector<8x1xf32> to vector<8x128xf32>
    %237 = arith.mulf %236, %225 : vector<8x128xf32>
    %238 = arith.truncf %237 : vector<8x128xf32> to vector<8x128xbf16>
    %c5 = arith.constant 5 : index
    %c0_54 = arith.constant 0 : index
    %c0_55 = arith.constant 0 : index
    %239 = vector.load %arg12[%c5, %c0_54, %c0_55] : memref<8x8x512xbf16, #tpu.memory_space<vmem>>, vector<1x8x512xbf16>
    %240 = vector.shape_cast %239 : vector<1x8x512xbf16> to vector<8x512xbf16>
    %241 = arith.extf %240 : vector<8x512xbf16> to vector<8x512xf32>
    %242 = arith.truncf %231 : vector<8x128xf32> to vector<8x128xbf16>
    %cst_56 = arith.constant dense<0.000000e+00> : vector<8x512xf32>
    %243 = tpu.matmul %242, %13, %cst_56 {dimension_numbers = #tpu.dot_dimension_numbers<[1], [0], [0], [1], [0, 0, 1, 1], [], []>} : vector<8x128xbf16>, vector<128x512xbf16>, vector<8x512xf32> -> vector<8x512xf32>
    %244 = arith.addf %241, %243 : vector<8x512xf32>
    %245 = vector.extract_strided_slice %244 {offsets = [0, 0], sizes = [8, 128], strides = [1, 1]} : vector<8x512xf32> to vector<8x128xf32>
    %246 = arith.negf %245 : vector<8x128xf32>
    %247 = math.exp %246 : vector<8x128xf32>
    %cst_57 = arith.constant 1.000000e+00 : f32
    %248 = vector.broadcast %cst_57 : f32 to vector<8x128xf32>
    %249 = arith.addf %248, %247 : vector<8x128xf32>
    %250 = arith.divf %248, %249 : vector<8x128xf32>
    %251 = vector.extract_strided_slice %244 {offsets = [0, 128], sizes = [8, 128], strides = [1, 1]} : vector<8x512xf32> to vector<8x128xf32>
    %252 = arith.negf %251 : vector<8x128xf32>
    %253 = math.exp %252 : vector<8x128xf32>
    %cst_58 = arith.constant 1.000000e+00 : f32
    %254 = vector.broadcast %cst_58 : f32 to vector<8x128xf32>
    %255 = arith.addf %254, %253 : vector<8x128xf32>
    %256 = arith.divf %254, %255 : vector<8x128xf32>
    %257 = vector.extract_strided_slice %244 {offsets = [0, 256], sizes = [8, 128], strides = [1, 1]} : vector<8x512xf32> to vector<8x128xf32>
    %258 = math.tanh %257 : vector<8x128xf32>
    %259 = vector.extract_strided_slice %244 {offsets = [0, 384], sizes = [8, 128], strides = [1, 1]} : vector<8x512xf32> to vector<8x128xf32>
    %260 = arith.negf %259 : vector<8x128xf32>
    %261 = math.exp %260 : vector<8x128xf32>
    %cst_59 = arith.constant 1.000000e+00 : f32
    %262 = vector.broadcast %cst_59 : f32 to vector<8x128xf32>
    %263 = arith.addf %262, %261 : vector<8x128xf32>
    %264 = arith.divf %262, %263 : vector<8x128xf32>
    %265 = arith.mulf %256, %235 : vector<8x128xf32>
    %266 = arith.mulf %250, %258 : vector<8x128xf32>
    %267 = arith.addf %265, %266 : vector<8x128xf32>
    %268 = math.tanh %267 : vector<8x128xf32>
    %269 = arith.mulf %264, %268 : vector<8x128xf32>
    %270 = vector.extract_strided_slice %16 {offsets = [5, 0, 0], sizes = [1, 8, 1], strides = [1, 1, 1]} : vector<8x8x1xf32> to vector<1x8x1xf32>
    %271 = vector.shape_cast %270 : vector<1x8x1xf32> to vector<8x1xf32>
    %272 = arith.subf %269, %231 : vector<8x128xf32>
    %273 = vector.broadcast %271 : vector<8x1xf32> to vector<8x128xf32>
    %274 = arith.mulf %273, %272 : vector<8x128xf32>
    %275 = arith.addf %231, %274 : vector<8x128xf32>
    %276 = arith.subf %267, %235 : vector<8x128xf32>
    %277 = vector.broadcast %271 : vector<8x1xf32> to vector<8x128xf32>
    %278 = arith.mulf %277, %276 : vector<8x128xf32>
    %279 = arith.addf %235, %278 : vector<8x128xf32>
    %280 = vector.broadcast %271 : vector<8x1xf32> to vector<8x128xf32>
    %281 = arith.mulf %280, %269 : vector<8x128xf32>
    %282 = arith.truncf %281 : vector<8x128xf32> to vector<8x128xbf16>
    %c6 = arith.constant 6 : index
    %c0_60 = arith.constant 0 : index
    %c0_61 = arith.constant 0 : index
    %283 = vector.load %arg12[%c6, %c0_60, %c0_61] : memref<8x8x512xbf16, #tpu.memory_space<vmem>>, vector<1x8x512xbf16>
    %284 = vector.shape_cast %283 : vector<1x8x512xbf16> to vector<8x512xbf16>
    %285 = arith.extf %284 : vector<8x512xbf16> to vector<8x512xf32>
    %286 = arith.truncf %275 : vector<8x128xf32> to vector<8x128xbf16>
    %cst_62 = arith.constant dense<0.000000e+00> : vector<8x512xf32>
    %287 = tpu.matmul %286, %13, %cst_62 {dimension_numbers = #tpu.dot_dimension_numbers<[1], [0], [0], [1], [0, 0, 1, 1], [], []>} : vector<8x128xbf16>, vector<128x512xbf16>, vector<8x512xf32> -> vector<8x512xf32>
    %288 = arith.addf %285, %287 : vector<8x512xf32>
    %289 = vector.extract_strided_slice %288 {offsets = [0, 0], sizes = [8, 128], strides = [1, 1]} : vector<8x512xf32> to vector<8x128xf32>
    %290 = arith.negf %289 : vector<8x128xf32>
    %291 = math.exp %290 : vector<8x128xf32>
    %cst_63 = arith.constant 1.000000e+00 : f32
    %292 = vector.broadcast %cst_63 : f32 to vector<8x128xf32>
    %293 = arith.addf %292, %291 : vector<8x128xf32>
    %294 = arith.divf %292, %293 : vector<8x128xf32>
    %295 = vector.extract_strided_slice %288 {offsets = [0, 128], sizes = [8, 128], strides = [1, 1]} : vector<8x512xf32> to vector<8x128xf32>
    %296 = arith.negf %295 : vector<8x128xf32>
    %297 = math.exp %296 : vector<8x128xf32>
    %cst_64 = arith.constant 1.000000e+00 : f32
    %298 = vector.broadcast %cst_64 : f32 to vector<8x128xf32>
    %299 = arith.addf %298, %297 : vector<8x128xf32>
    %300 = arith.divf %298, %299 : vector<8x128xf32>
    %301 = vector.extract_strided_slice %288 {offsets = [0, 256], sizes = [8, 128], strides = [1, 1]} : vector<8x512xf32> to vector<8x128xf32>
    %302 = math.tanh %301 : vector<8x128xf32>
    %303 = vector.extract_strided_slice %288 {offsets = [0, 384], sizes = [8, 128], strides = [1, 1]} : vector<8x512xf32> to vector<8x128xf32>
    %304 = arith.negf %303 : vector<8x128xf32>
    %305 = math.exp %304 : vector<8x128xf32>
    %cst_65 = arith.constant 1.000000e+00 : f32
    %306 = vector.broadcast %cst_65 : f32 to vector<8x128xf32>
    %307 = arith.addf %306, %305 : vector<8x128xf32>
    %308 = arith.divf %306, %307 : vector<8x128xf32>
    %309 = arith.mulf %300, %279 : vector<8x128xf32>
    %310 = arith.mulf %294, %302 : vector<8x128xf32>
    %311 = arith.addf %309, %310 : vector<8x128xf32>
    %312 = math.tanh %311 : vector<8x128xf32>
    %313 = arith.mulf %308, %312 : vector<8x128xf32>
    %314 = vector.extract_strided_slice %16 {offsets = [6, 0, 0], sizes = [1, 8, 1], strides = [1, 1, 1]} : vector<8x8x1xf32> to vector<1x8x1xf32>
    %315 = vector.shape_cast %314 : vector<1x8x1xf32> to vector<8x1xf32>
    %316 = arith.subf %313, %275 : vector<8x128xf32>
    %317 = vector.broadcast %315 : vector<8x1xf32> to vector<8x128xf32>
    %318 = arith.mulf %317, %316 : vector<8x128xf32>
    %319 = arith.addf %275, %318 : vector<8x128xf32>
    %320 = arith.subf %311, %279 : vector<8x128xf32>
    %321 = vector.broadcast %315 : vector<8x1xf32> to vector<8x128xf32>
    %322 = arith.mulf %321, %320 : vector<8x128xf32>
    %323 = arith.addf %279, %322 : vector<8x128xf32>
    %324 = vector.broadcast %315 : vector<8x1xf32> to vector<8x128xf32>
    %325 = arith.mulf %324, %313 : vector<8x128xf32>
    %326 = arith.truncf %325 : vector<8x128xf32> to vector<8x128xbf16>
    %c7 = arith.constant 7 : index
    %c0_66 = arith.constant 0 : index
    %c0_67 = arith.constant 0 : index
    %327 = vector.load %arg12[%c7, %c0_66, %c0_67] : memref<8x8x512xbf16, #tpu.memory_space<vmem>>, vector<1x8x512xbf16>
    %328 = vector.shape_cast %327 : vector<1x8x512xbf16> to vector<8x512xbf16>
    %329 = arith.extf %328 : vector<8x512xbf16> to vector<8x512xf32>
    %330 = arith.truncf %319 : vector<8x128xf32> to vector<8x128xbf16>
    %cst_68 = arith.constant dense<0.000000e+00> : vector<8x512xf32>
    %331 = tpu.matmul %330, %13, %cst_68 {dimension_numbers = #tpu.dot_dimension_numbers<[1], [0], [0], [1], [0, 0, 1, 1], [], []>} : vector<8x128xbf16>, vector<128x512xbf16>, vector<8x512xf32> -> vector<8x512xf32>
    %332 = arith.addf %329, %331 : vector<8x512xf32>
    %333 = vector.extract_strided_slice %332 {offsets = [0, 0], sizes = [8, 128], strides = [1, 1]} : vector<8x512xf32> to vector<8x128xf32>
    %334 = arith.negf %333 : vector<8x128xf32>
    %335 = math.exp %334 : vector<8x128xf32>
    %cst_69 = arith.constant 1.000000e+00 : f32
    %336 = vector.broadcast %cst_69 : f32 to vector<8x128xf32>
    %337 = arith.addf %336, %335 : vector<8x128xf32>
    %338 = arith.divf %336, %337 : vector<8x128xf32>
    %339 = vector.extract_strided_slice %332 {offsets = [0, 128], sizes = [8, 128], strides = [1, 1]} : vector<8x512xf32> to vector<8x128xf32>
    %340 = arith.negf %339 : vector<8x128xf32>
    %341 = math.exp %340 : vector<8x128xf32>
    %cst_70 = arith.constant 1.000000e+00 : f32
    %342 = vector.broadcast %cst_70 : f32 to vector<8x128xf32>
    %343 = arith.addf %342, %341 : vector<8x128xf32>
    %344 = arith.divf %342, %343 : vector<8x128xf32>
    %345 = vector.extract_strided_slice %332 {offsets = [0, 256], sizes = [8, 128], strides = [1, 1]} : vector<8x512xf32> to vector<8x128xf32>
    %346 = math.tanh %345 : vector<8x128xf32>
    %347 = vector.extract_strided_slice %332 {offsets = [0, 384], sizes = [8, 128], strides = [1, 1]} : vector<8x512xf32> to vector<8x128xf32>
    %348 = arith.negf %347 : vector<8x128xf32>
    %349 = math.exp %348 : vector<8x128xf32>
    %cst_71 = arith.constant 1.000000e+00 : f32
    %350 = vector.broadcast %cst_71 : f32 to vector<8x128xf32>
    %351 = arith.addf %350, %349 : vector<8x128xf32>
    %352 = arith.divf %350, %351 : vector<8x128xf32>
    %353 = arith.mulf %344, %323 : vector<8x128xf32>
    %354 = arith.mulf %338, %346 : vector<8x128xf32>
    %355 = arith.addf %353, %354 : vector<8x128xf32>
    %356 = math.tanh %355 : vector<8x128xf32>
    %357 = arith.mulf %352, %356 : vector<8x128xf32>
    %358 = vector.extract_strided_slice %16 {offsets = [7, 0, 0], sizes = [1, 8, 1], strides = [1, 1, 1]} : vector<8x8x1xf32> to vector<1x8x1xf32>
    %359 = vector.shape_cast %358 : vector<1x8x1xf32> to vector<8x1xf32>
    %360 = arith.subf %357, %319 : vector<8x128xf32>
    %361 = vector.broadcast %359 : vector<8x1xf32> to vector<8x128xf32>
    %362 = arith.mulf %361, %360 : vector<8x128xf32>
    %363 = arith.addf %319, %362 : vector<8x128xf32>
    %364 = arith.subf %355, %323 : vector<8x128xf32>
    %365 = vector.broadcast %359 : vector<8x1xf32> to vector<8x128xf32>
    %366 = arith.mulf %365, %364 : vector<8x128xf32>
    %367 = arith.addf %323, %366 : vector<8x128xf32>
    %368 = vector.broadcast %359 : vector<8x1xf32> to vector<8x128xf32>
    %369 = arith.mulf %368, %357 : vector<8x128xf32>
    %370 = arith.truncf %369 : vector<8x128xf32> to vector<8x128xbf16>
    %371 = vector.shape_cast %62 : vector<8x128xbf16> to vector<1x8x128xbf16>
    %372 = vector.shape_cast %106 : vector<8x128xbf16> to vector<1x8x128xbf16>
    %373 = vector.shape_cast %150 : vector<8x128xbf16> to vector<1x8x128xbf16>
    %374 = vector.shape_cast %194 : vector<8x128xbf16> to vector<1x8x128xbf16>
    %375 = vector.shape_cast %238 : vector<8x128xbf16> to vector<1x8x128xbf16>
    %376 = vector.shape_cast %282 : vector<8x128xbf16> to vector<1x8x128xbf16>
    %377 = vector.shape_cast %326 : vector<8x128xbf16> to vector<1x8x128xbf16>
    %378 = vector.shape_cast %370 : vector<8x128xbf16> to vector<1x8x128xbf16>
    %379 = tpu.concatenate %371, %372, %373, %374, %375, %376, %377, %378 in 0 : vector<1x8x128xbf16>, vector<1x8x128xbf16>, vector<1x8x128xbf16>, vector<1x8x128xbf16>, vector<1x8x128xbf16>, vector<1x8x128xbf16>, vector<1x8x128xbf16>, vector<1x8x128xbf16> -> vector<8x8x128xbf16>
    %380 = vector.shape_cast %379 : vector<8x8x128xbf16> to vector<64x128xbf16>
    %cst_72 = arith.constant dense<0.000000e+00> : vector<64x128xf32>
    %381 = tpu.matmul %380, %14, %cst_72 {dimension_numbers = #tpu.dot_dimension_numbers<[1], [0], [0], [1], [0, 0, 1, 1], [], []>} : vector<64x128xbf16>, vector<128x128xbf16>, vector<64x128xf32> -> vector<64x128xf32>
    %382 = vector.broadcast %15 : vector<1x128xf32> to vector<64x128xf32>
    %383 = arith.addf %381, %382 : vector<64x128xf32>
    %384 = vector.shape_cast %383 : vector<64x128xf32> to vector<8x8x128xf32>
    %c0_73 = arith.constant 0 : index
    %c0_74 = arith.constant 0 : index
    %c0_75 = arith.constant 0 : index
    %385 = vector.load %arg9[%c0_73, %c0_74, %c0_75] : memref<8x8x128xf32, #tpu.memory_space<vmem>>, vector<8x8x128xf32>
    tpu.vector_store %arg9[%c0_73, %c0_74, %c0_75], %384 {strides = array<i32>} : memref<8x8x128xf32, #tpu.memory_space<vmem>>, vector<8x8x128xf32>,
    %c0_76 = arith.constant 0 : index
    %c0_77 = arith.constant 0 : index
    %386 = vector.load %arg10[%c0_76, %c0_77] : memref<8x128xf32, #tpu.memory_space<vmem>>, vector<8x128xf32>
    tpu.vector_store %arg10[%c0_76, %c0_77], %363 {strides = array<i32>} : memref<8x128xf32, #tpu.memory_space<vmem>>, vector<8x128xf32>,
    %c0_78 = arith.constant 0 : index
    %c0_79 = arith.constant 0 : index
    %387 = vector.load %arg11[%c0_78, %c0_79] : memref<8x128xf32, #tpu.memory_space<vmem>>, vector<8x128xf32>
    tpu.vector_store %arg11[%c0_78, %c0_79], %367 {strides = array<i32>} : memref<8x128xf32, #tpu.memory_space<vmem>>, vector<8x128xf32>,
    return
  }
  func.func @transform_0(%arg0: i32, %arg1: i32) -> (i32, i32, i32) {
    %c0_i32 = arith.constant 0 : i32
    %c0_i32_0 = arith.constant 0 : i32
    return %arg1, %arg0, %c0_i32 : i32, i32, i32
  }
  func.func @transform_1(%arg0: i32, %arg1: i32) -> (i32, i32, i32) {
    %c0_i32 = arith.constant 0 : i32
    %c0_i32_0 = arith.constant 0 : i32
    return %arg1, %arg0, %c0_i32 : i32, i32, i32
  }
  func.func @transform_2(%arg0: i32, %arg1: i32) -> (i32, i32) {
    %c0_i32 = arith.constant 0 : i32
    %c0_i32_0 = arith.constant 0 : i32
    %c0_i32_1 = arith.constant 0 : i32
    return %c0_i32, %c0_i32_0 : i32, i32
  }
  func.func @transform_3(%arg0: i32, %arg1: i32) -> (i32, i32) {
    %c0_i32 = arith.constant 0 : i32
    %c0_i32_0 = arith.constant 0 : i32
    %c0_i32_1 = arith.constant 0 : i32
    return %c0_i32, %c0_i32_0 : i32, i32
  }
  func.func @transform_4(%arg0: i32, %arg1: i32) -> (i32, i32) {
    %c0_i32 = arith.constant 0 : i32
    %c0_i32_0 = arith.constant 0 : i32
    %c0_i32_1 = arith.constant 0 : i32
    return %c0_i32, %c0_i32_0 : i32, i32
  }
  func.func @transform_5(%arg0: i32, %arg1: i32) -> (i32, i32) {
    %c0_i32 = arith.constant 0 : i32
    %c0_i32_0 = arith.constant 0 : i32
    %c0_i32_1 = arith.constant 0 : i32
    return %c0_i32, %c0_i32_0 : i32, i32
  }
  func.func @transform_6(%arg0: i32, %arg1: i32) -> (i32, i32) {
    %c0_i32 = arith.constant 0 : i32
    %c0_i32_0 = arith.constant 0 : i32
    %c0_i32_1 = arith.constant 0 : i32
    return %c0_i32, %c0_i32_0 : i32, i32
  }
  func.func @transform_7(%arg0: i32, %arg1: i32) -> (i32, i32, i32) {
    %c0_i32 = arith.constant 0 : i32
    %c0_i32_0 = arith.constant 0 : i32
    return %arg1, %arg0, %c0_i32 : i32, i32, i32
  }
}

</mosaic_0001>

<bundles_post_ra>
// kernel: _lambda_.1
= control target key start
LH: loop header
LB: loop body
LE: loop exit
PB: predicated region body
PF: predicated region fallthrough
CT: control target
= control target key end

     0   :  { %v3467_v1 = vmov 0   ;;  %v2442_v39 = vmov 0.0|0.0   ;;  %s3459_s2 = inlined_call_operand.vmem [shape: bf16[128,512], index: 2, kind: input, shape index: {}]   ;;  %s3460_s3 = inlined_call_operand.vmem [shape: bf16[128,512], index: 3, kind: input, shape index: {}]   ;;  %s3461_s0 = inlined_call_operand.vmem [shape: bf16[8,8,128], index: 0, kind: input, shape index: {}]   ;;  %s3462_s1 = inlined_call_operand.vmem [shape: f32[8,8,1], index: 1, kind: input, shape index: {}]   ;;  %s3463_s4 = inlined_call_operand.vmem [shape: f32[1,512], index: 4, kind: input, shape index: {}]   ;;  %s3464_s5 = inlined_call_operand.vmem [shape: bf16[128,128], index: 5, kind: input, shape index: {}]   ;;  %s3465_s6 = inlined_call_operand.vmem [shape: f32[1,128], index: 6, kind: input, shape index: {}]   ;;  %s3466_s7 = inlined_call_operand.vmem [shape: f32[8,8,128], index: 7, kind: output, shape index: {}]  }
   0x1   :  { %v2173_v0 = vld [vmem:[%s3459_s2 + $0xe4] ss:$16 sps:$4 sm:$0xff]   ;;  %311 = vmatprep.mubr.bf16.mxu1 %v3467_v1  ;;  %827 = vmatprep.mubr.bf16.mxu0 %v3467_v1  ;;  %v2175_v2 = vld [vmem:[%s3459_s2 + $0xe0] ss:$16 sps:$4 sm:$0xff]   ;;  %v2221_v32 = vld [vmem:[%s3459_s2 + $0xec] ss:$16 sps:$4 sm:$0xff]  }
   0x2   :  { %2171 = vset.pattern.permute.xlu0 %v3467_v1  ;;  %2172 = vset.pattern.permute.xlu1 %v3467_v1  ;;  %v2176_v3 = vld [vmem:[%s3459_s2 + $0xc4] ss:$16 sps:$4 sm:$0xff]   ;;  %v2178_v4 = vld [vmem:[%s3459_s2 + $0xc0] ss:$16 sps:$4 sm:$0xff]   ;;  %v2219_v35 = vld [vmem:[%s3459_s2 + $0xe8] ss:$16 sps:$4 sm:$0xff]  }
   0x3   :  { %279 = vmatprep.subr.bf16.mxu1 %v2173_v0  ;;  %v2502_v5 = vld [vmem:[%s3460_s3 + $0xe4] ss:$16 sps:$4 sm:$0xff]   ;;  %v2507_v6 = vld [vmem:[%s3460_s3 + $0xe0] ss:$16 sps:$4 sm:$0xff]   ;;  %v2227_v36 = vld [vmem:[%s3459_s2 + $0xcc] ss:$16 sps:$4 sm:$0xff]  }
   0x4   :  { %280 = vmatpush1.bf16.msra.mxu1 %v2175_v2  ;;  %v2182_v7 = vld [vmem:[%s3459_s2 + $0xa4] ss:$16 sps:$4 sm:$0xff]   ;;  %795 = vmatprep.subr.bf16.mxu0 %v2502_v5  ;;  %v2522_v9 = vld [vmem:[%s3460_s3 + $0xc0] ss:$16 sps:$4 sm:$0xff]   ;;  %v2225_v37 = vld [vmem:[%s3459_s2 + $0xc8] ss:$16 sps:$4 sm:$0xff]  }
   0x5   :  { %281 = vmatprep.subr.bf16.mxu1 %v2176_v3  ;;  %796 = vmatpush1.bf16.msra.mxu0 %v2507_v6  ;;  %v2517_v8 = vld [vmem:[%s3460_s3 + $0xc4] ss:$16 sps:$4 sm:$0xff]   ;;  %v2184_v10 = vld [vmem:[%s3459_s2 + $0xa0] ss:$16 sps:$4 sm:$0xff]   ;;  %v2231_v38 = vld [vmem:[%s3459_s2 + $0xac] ss:$16 sps:$4 sm:$0xff]  }
   0x6   :  { %v2188_v11 = vld [vmem:[%s3459_s2 + $0x84] ss:$16 sps:$4 sm:$0xff]   ;;  %797 = vmatprep.subr.bf16.mxu0 %v2517_v8  ;;  %v2540_v13 = vld [vmem:[%s3460_s3 + $0xa0] ss:$16 sps:$4 sm:$0xff]   ;;  %v2658_v40 = vld [vmem:[%s3461_s0 + $0x8] sm:$0xff]  }
   0x7   :  { %v2534_v12 = vld [vmem:[%s3460_s3 + $0xa4] ss:$16 sps:$4 sm:$0xff]   ;;  %v2190_v14 = vld [vmem:[%s3459_s2 + $0x80] ss:$16 sps:$4 sm:$0xff]   ;;  %v2229_v41 = vld [vmem:[%s3459_s2 + $0xa8] ss:$16 sps:$4 sm:$0xff]  }
   0x8   :  { %282 = vmatpush1.bf16.msra.mxu1 %v2178_v4  ;;  %v2549_v15 = vld [vmem:[%s3460_s3 + $0x84] ss:$16 sps:$4 sm:$0xff]   ;;  %v2558_v17 = vld [vmem:[%s3460_s3 + $0x80] ss:$16 sps:$4 sm:$0xff]   ;;  %v2234_v42 = vld [vmem:[%s3459_s2 + $0x8c] ss:$16 sps:$4 sm:$0xff]  }
   0x9   :  { %283 = vmatprep.subr.bf16.mxu1 %v2182_v7  ;;  %798 = vmatpush1.bf16.msra.mxu0 %v2522_v9  ;;  %v2194_v16 = vld [vmem:[%s3459_s2 + $0x64] ss:$16 sps:$4 sm:$0xff]   ;;  %v2196_v18 = vld [vmem:[%s3459_s2 + $0x60] ss:$16 sps:$4 sm:$0xff]   ;;  %v2232_v43 = vld [vmem:[%s3459_s2 + $0x88] ss:$16 sps:$4 sm:$0xff]  }
   0xa   :  { %799 = vmatprep.subr.bf16.mxu0 %v2534_v12  ;;  %v2567_v19 = vld [vmem:[%s3460_s3 + $0x64] ss:$16 sps:$4 sm:$0xff]   ;;  %v2576_v21 = vld [vmem:[%s3460_s3 + $0x60] ss:$16 sps:$4 sm:$0xff]   ;;  %v2238_v44 = vld [vmem:[%s3459_s2 + $0x6c] ss:$16 sps:$4 sm:$0xff]  }
   0xb   :  { %v2200_v20 = vld [vmem:[%s3459_s2 + $0x44] ss:$16 sps:$4 sm:$0xff]   ;;  %v2202_v22 = vld [vmem:[%s3459_s2 + $0x40] ss:$16 sps:$4 sm:$0xff]   ;;  %v2236_v47 = vld [vmem:[%s3459_s2 + $0x68] ss:$16 sps:$4 sm:$0xff]  }
   0xc   :  { %284 = vmatpush1.bf16.msra.mxu1 %v2184_v10  ;;  %v2585_v23 = vld [vmem:[%s3460_s3 + $0x44] ss:$16 sps:$4 sm:$0xff]   ;;  %v2594_v25 = vld [vmem:[%s3460_s3 + $0x40] ss:$16 sps:$4 sm:$0xff]   ;;  %v2241_v48 = vld [vmem:[%s3459_s2 + $0x4c] ss:$16 sps:$4 sm:$0xff]  }
   0xd   :  { %285 = vmatprep.subr.bf16.mxu1 %v2188_v11  ;;  %800 = vmatpush1.bf16.msra.mxu0 %v2540_v13  ;;  %v2206_v24 = vld [vmem:[%s3459_s2 + $0x24] ss:$16 sps:$4 sm:$0xff]   ;;  %v2208_v26 = vld [vmem:[%s3459_s2 + $0x20] ss:$16 sps:$4 sm:$0xff]   ;;  %v619_v49 = vld [vmem:[%s3462_s1 + $0x8] sm:$0xff] }
   0xe   :  { %801 = vmatprep.subr.bf16.mxu0 %v2549_v15  ;;  %v2603_v27 = vld [vmem:[%s3460_s3 + $0x24] ss:$16 sps:$4 sm:$0xff]   ;;  %v2214_v29 = vld [vmem:[%s3459_s2] ss:$16 sps:$4 sm:$0xff]   ;;  %v2239_v50 = vld [vmem:[%s3459_s2 + $0x48] ss:$16 sps:$4 sm:$0xff]  }
   0xf   :  { %v2212_v28 = vld [vmem:[%s3459_s2 + $0x4] ss:$16 sps:$4 sm:$0xff]   ;;  %v2615_v30 = vld [vmem:[%s3460_s3 + $0x20] ss:$16 sps:$4 sm:$0xff]   ;;  %v2245_v51 = vld [vmem:[%s3459_s2 + $0x2c] ss:$16 sps:$4 sm:$0xff]  }
  0x10   :  { %286 = vmatpush1.bf16.msra.mxu1 %v2190_v14  ;;  %v2621_v31 = vld [vmem:[%s3460_s3 + $0x4] ss:$16 sps:$4 sm:$0xff]   ;;  %v2635_v34 = vld [vmem:[%s3460_s3] ss:$16 sps:$4 sm:$0xff]   ;;  %v2242_v53 = vld [vmem:[%s3461_s0 + $0x18] sm:$0xff]  }
  0x11   :  { %287 = vmatprep.subr.bf16.mxu1 %v2194_v16  ;;  %802 = vmatpush1.bf16.msra.mxu0 %v2558_v17  ;;  %v2630_v33 = vld [vmem:[%s3461_s0] sm:$0xff]   ;;  %v2682_v45 = vld [vmem:[%s3461_s0 + $0x10] sm:$0xff]   ;;  %v2243_v54 = vld [vmem:[%s3459_s2 + $0x28] ss:$16 sps:$4 sm:$0xff]  }
  0x12   :  { %803 = vmatprep.subr.bf16.mxu0 %v2567_v19  ;;  %v618_v46 = vld [vmem:[%s3462_s1] sm:$0xff]  ;;  %v2248_v55 = vld [vmem:[%s3459_s2 + $0xc] ss:$16 sps:$4 sm:$0xff]   ;;  %v624_v56 = vld [vmem:[%s3462_s1 + $0x30] sm:$0xff] }
  0x13   :  { %908 = vperm.xlu0 %2171, %v618_v46   ;;  %v622_v52 = vld [vmem:[%s3462_s1 + $0x20] sm:$0xff]  ;;  %v2246_v57 = vld [vmem:[%s3459_s2 + $0x8] ss:$16 sps:$4 sm:$0xff]   ;;  %v2733_v58 = vld [vmem:[%s3460_s3 + $0xec] ss:$16 sps:$4 sm:$0xff]  }
  0x14   :  { %288 = vmatpush1.bf16.msra.mxu1 %v2196_v18  ;;  %v2740_v59 = vld [vmem:[%s3460_s3 + $0xe8] ss:$16 sps:$4 sm:$0xff]   ;;  %v2747_v60 = vld [vmem:[%s3460_s3 + $0xcc] ss:$16 sps:$4 sm:$0xff]  }
  0x15   :  { %289 = vmatprep.subr.bf16.mxu1 %v2200_v20  ;;  %804 = vmatpush1.bf16.msra.mxu0 %v2576_v21  ;;  %v2755_v61 = vld [vmem:[%s3460_s3 + $0xc8] ss:$16 sps:$4 sm:$0xff]   ;;  %v2762_v62 = vld [vmem:[%s3460_s3 + $0xac] ss:$16 sps:$4 sm:$0xff]   ;;  %v75_v20 = vlaneseq }
  0x16   :  { %805 = vmatprep.subr.bf16.mxu0 %v2585_v23  ;;  %v2769_v63 = vld [vmem:[%s3460_s3 + $0xa8] ss:$16 sps:$4 sm:$0xff]   ;;  %v2775_v0 = vld [vmem:[%s3460_s3 + $0x8c] ss:$16 sps:$4 sm:$0xff]  }
  0x17   :  { %1039 = vperm.xlu0 %2171, %v619_v49   ;;  %v2782_v2 = vld [vmem:[%s3460_s3 + $0x88] ss:$16 sps:$4 sm:$0xff]   ;;  %v2789_v3 = vld [vmem:[%s3460_s3 + $0x6c] ss:$16 sps:$4 sm:$0xff]  }
  0x18   :  { %290 = vmatpush1.bf16.msra.mxu1 %v2202_v22  ;;  %v2795_v4 = vld [vmem:[%s3460_s3 + $0x68] ss:$16 sps:$4 sm:$0xff]   ;;  %v2801_v7 = vld [vmem:[%s3460_s3 + $0x4c] ss:$16 sps:$4 sm:$0xff]   ;;  %v76_v22 = vshrl.u32 %v75_v20, 7 }
  0x19   :  { %291 = vmatprep.subr.bf16.mxu1 %v2206_v24  ;;  %806 = vmatpush1.bf16.msra.mxu0 %v2594_v25  ;;  %v2808_v10 = vld [vmem:[%s3460_s3 + $0x48] ss:$16 sps:$4 sm:$0xff]   ;;  %v2815_v11 = vld [vmem:[%s3460_s3 + $0x2c] ss:$16 sps:$4 sm:$0xff]  }
  0x1a   :  { %807 = vmatprep.subr.bf16.mxu0 %v2603_v27  ;;  %v2821_v14 = vld [vmem:[%s3460_s3 + $0x28] ss:$16 sps:$4 sm:$0xff]   ;;  %v2827_v16 = vld [vmem:[%s3460_s3 + $0xc] ss:$16 sps:$4 sm:$0xff]   ;;  %v77_v24 = vsub.s32 0, %v76_v22 }
  0x1b   :  { %1432 = vperm.xlu0 %2171, %v622_v52   ;;  %v2833_v18 = vld [vmem:[%s3460_s3 + $0x8] ss:$16 sps:$4 sm:$0xff]  }
  0x1c   :  { %292 = vmatpush1.bf16.msra.mxu1 %v2208_v26  ;;  %v73_v26 = vld [vmem:[%s3463_s4] sm:$0xf] }
  0x1d   :  { %293 = vmatprep.subr.bf16.mxu1 %v2212_v28  ;;  %808 = vmatpush1.bf16.msra.mxu0 %v2615_v30 }
  0x1e   :  { %809 = vmatprep.subr.bf16.mxu0 %v2621_v31 }
  0x1f   :  { %1694 = vperm.xlu0 %2171, %v624_v56  }
  0x20   :  { %294 = vmatpush1.bf16.msra.mxu1 %v2214_v29  ;;  %v81_v29 = vsub.s32 1, %v76_v22 }
  0x21   :  { %352 = vmatprep.subr.bf16.mxu1 %v2221_v32  ;;  %810 = vmatpush1.bf16.msra.mxu0 %v2635_v34 }
  0x22   :  { %926 = vmatprep.subr.bf16.mxu0 %v2502_v5 }
  0x23   :  { %312 = vmatmul.mubr.bf16.vlgmr.msra.gmra.mxu1 %v2630_v33 }
  0x24   :  { %353 = vmatpush1.bf16.msra.mxu1 %v2219_v35  ;;  %321 = vmatprep.mubr.bf16.mxu1 %v3467_v1 }
  0x25   :  { %354 = vmatprep.subr.bf16.mxu1 %v2227_v36  ;;  %828 = vmatmul.mubr.bf16.vlgmr.msra.gmra.mxu0 %v2442_v39 }
  0x26   :  { %927 = vmatpush1.bf16.msra.mxu0 %v2507_v6  ;;  %958 = vmatprep.mubr.bf16.mxu0 %v3467_v1 }
  0x27   :  { %928 = vmatprep.subr.bf16.mxu0 %v2517_v8 }
  0x28   :  { %355 = vmatpush1.bf16.msra.mxu1 %v2225_v37  ;;  %v82_v37 = vrot.slane %v73_v26, %v81_v29 }
  0x29   :  { %356 = vmatprep.subr.bf16.mxu1 %v2231_v38 }
  0x2a   :  { %929 = vmatpush1.bf16.msra.mxu0 %v2522_v9 }
  0x2b   :  { %322 = vmatmul.mubr.bf16.gmra.mxu1 %v2658_v40  ;;  %930 = vmatprep.subr.bf16.mxu0 %v2534_v12 }
  0x2c   :  { %357 = vmatpush1.bf16.msra.mxu1 %v2229_v41  ;;  %331 = vmatprep.mubr.bf16.mxu1 %v3467_v1 }
  0x2d   :  { %358 = vmatprep.subr.bf16.mxu1 %v2234_v42 }
  0x2e   :  { %931 = vmatpush1.bf16.msra.mxu0 %v2540_v13 }
  0x2f   :  { %932 = vmatprep.subr.bf16.mxu0 %v2549_v15 }
  0x30   :  { %359 = vmatpush1.bf16.msra.mxu1 %v2232_v43 }
  0x31   :  { %360 = vmatprep.subr.bf16.mxu1 %v2238_v44 }
  0x32   :  { %933 = vmatpush1.bf16.msra.mxu0 %v2558_v17 }
  0x33   :  { %332 = vmatmul.mubr.bf16.gmra.mxu1 %v2682_v45  ;;  %934 = vmatprep.subr.bf16.mxu0 %v2567_v19 }
  0x34   :  { %361 = vmatpush1.bf16.msra.mxu1 %v2236_v47  ;;  %341 = vmatprep.mubr.bf16.mxu1 %v3467_v1 }
  0x35   :  { %362 = vmatprep.subr.bf16.mxu1 %v2241_v48 }
  0x36   :  { %935 = vmatpush1.bf16.msra.mxu0 %v2576_v21 }
  0x37   :  { %936 = vmatprep.subr.bf16.mxu0 %v2585_v23 }
  0x38   :  { %363 = vmatpush1.bf16.msra.mxu1 %v2239_v50 }
  0x39   :  { %364 = vmatprep.subr.bf16.mxu1 %v2245_v51 }
  0x3a   :  { %937 = vmatpush1.bf16.msra.mxu0 %v2594_v25 }
  0x3b   :  { %342 = vmatmul.mubr.bf16.gmra.mxu1 %v2242_v53  ;;  %938 = vmatprep.subr.bf16.mxu0 %v2603_v27 }
  0x3c   :  { %365 = vmatpush1.bf16.msra.mxu1 %v2243_v54  ;;  %384 = vmatprep.mubr.bf16.mxu1 %v3467_v1 }
  0x3d   :  { %366 = vmatprep.subr.bf16.mxu1 %v2248_v55 }
  0x3e   :  { %939 = vmatpush1.bf16.msra.mxu0 %v2615_v30 }
  0x3f   :  { %940 = vmatprep.subr.bf16.mxu0 %v2621_v31 }
  0x40   :  { %367 = vmatpush1.bf16.msra.mxu1 %v2246_v57 }
  0x41   :  { %836 = vmatprep.subr.bf16.mxu1 %v2733_v58 }
  0x42   :  { %941 = vmatpush1.bf16.msra.mxu0 %v2635_v34 }
  0x43   :  { %385 = vmatmul.mubr.bf16.vlgmr.msra.gmra.mxu1 %v2630_v33  ;;  %1057 = vmatprep.subr.bf16.mxu0 %v2502_v5  ;;  %v78_v33 = vrot.slane %v73_v26, %v77_v24 }
  0x44   :  { %837 = vmatpush1.bf16.msra.mxu1 %v2740_v59  ;;  %394 = vmatprep.mubr.bf16.mxu1 %v3467_v1 }
  0x45   :  { %838 = vmatprep.subr.bf16.mxu1 %v2747_v60 }
  0x48   :  { %839 = vmatpush1.bf16.msra.mxu1 %v2755_v61 }
  0x49   :  { %840 = vmatprep.subr.bf16.mxu1 %v2762_v62 }
  0x4b   :  { %395 = vmatmul.mubr.bf16.gmra.mxu1 %v2658_v40 }
  0x4c   :  { %841 = vmatpush1.bf16.msra.mxu1 %v2769_v63  ;;  %404 = vmatprep.mubr.bf16.mxu1 %v3467_v1 }
  0x4d   :  { %842 = vmatprep.subr.bf16.mxu1 %v2775_v0 }
  0x50   :  { %843 = vmatpush1.bf16.msra.mxu1 %v2782_v2 }
  0x51   :  { %844 = vmatprep.subr.bf16.mxu1 %v2789_v3 }
  0x53   :  { %405 = vmatmul.mubr.bf16.gmra.mxu1 %v2682_v45 }
  0x54   :  { %845 = vmatpush1.bf16.msra.mxu1 %v2795_v4  ;;  %414 = vmatprep.mubr.bf16.mxu1 %v3467_v1 }
  0x55   :  { %846 = vmatprep.subr.bf16.mxu1 %v2801_v7 }
  0x58   :  { %847 = vmatpush1.bf16.msra.mxu1 %v2808_v10 }
  0x59   :  { %848 = vmatprep.subr.bf16.mxu1 %v2815_v11 }
  0x5b   :  { %415 = vmatmul.mubr.bf16.gmra.mxu1 %v2242_v53 }
  0x5c   :  { %849 = vmatpush1.bf16.msra.mxu1 %v2821_v14  ;;  %868 = vmatprep.mubr.bf16.mxu1 %v3467_v1 }
  0x5d   :  { %850 = vmatprep.subr.bf16.mxu1 %v2827_v16 }
  0x60   :  { %851 = vmatpush1.bf16.msra.mxu1 %v2833_v18 }
  0x61   :  { %967 = vmatprep.subr.bf16.mxu1 %v2733_v58 }
  0x63   :  { %869 = vmatmul.mubr.bf16.vlgmr.msra.gmra.mxu1 %v2442_v39 }
  0x64   :  { %968 = vmatpush1.bf16.msra.mxu1 %v2740_v59  ;;  %999 = vmatprep.mubr.bf16.mxu1 %v3467_v1 }
  0x65   :  { %969 = vmatprep.subr.bf16.mxu1 %v2747_v60 }
  0x68   :  { %970 = vmatpush1.bf16.msra.mxu1 %v2755_v61 }
  0x69   :  { %971 = vmatprep.subr.bf16.mxu1 %v2762_v62 }
  0x6c   :  { %972 = vmatpush1.bf16.msra.mxu1 %v2769_v63 }
  0x6d   :  { %973 = vmatprep.subr.bf16.mxu1 %v2775_v0 }
  0x70   :  { %974 = vmatpush1.bf16.msra.mxu1 %v2782_v2 }
  0x71   :  { %975 = vmatprep.subr.bf16.mxu1 %v2789_v3 }
  0x74   :  { %976 = vmatpush1.bf16.msra.mxu1 %v2795_v4 }
  0x75   :  { %977 = vmatprep.subr.bf16.mxu1 %v2801_v7 }
  0x78   :  { %978 = vmatpush1.bf16.msra.mxu1 %v2808_v10 }
  0x79   :  { %979 = vmatprep.subr.bf16.mxu1 %v2815_v11 }
  0x7c   :  { %980 = vmatpush1.bf16.msra.mxu1 %v2821_v14 }
  0x7d   :  { %981 = vmatprep.subr.bf16.mxu1 %v2827_v16 }
  0x80   :  { %982 = vmatpush1.bf16.msra.mxu1 %v2833_v18 }
  0x81   :  { %1098 = vmatprep.subr.bf16.mxu1 %v2733_v58 }
  0xe3   :  { %v313_v28 = vpop.f32.mrf.mxu1 }
  0xe5   :  { %v315_v32 = vpop.f32.mrf.mxu1  ;;  %v829_v35 = vpop.f32.mrf.mxu0 }
  0xe7   :  { %v317_v36 = vpop.f32.mrf.mxu1  ;;  %v831_v39 = vpop.f32.mrf.mxu0 }
  0xe8   :  { %v318_v38 = vadd.f32 %v317_v36, %v78_v33 }
  0xe9   :  { %v319_v40 = vpop.f32.mrf.mxu1  ;;  %v833_v42 = vpop.f32.mrf.mxu0 }
  0xea   :  { %v320_v41 = vadd.f32 %v319_v40, %v82_v37  ;;  %v316_v42 = vadd.f32 %v315_v32, %v82_v37 }
  0xeb   :  { %v323_v43 = vpop.f32.mrf.mxu1  ;;  %v834_v46 = vpop.f32.mrf.mxu0 }
  0xec   :  { %v2860_v44 = vpack.c.bf16 %v320_v41, %v318_v38  ;;  %v324_v45 = vadd.f32 %v323_v43, %v78_v33 }
  0xed   :  { %v325_v47 = vpop.f32.mrf.mxu1 }
  0xee   :  { %v326_v48 = vadd.f32 %v325_v47, %v82_v37  ;;  %v314_v47 = vadd.f32 %v313_v28, %v78_v33 }
  0xef   :  { %v327_v49 = vpop.f32.mrf.mxu1 }
  0xf0   :  { %v2862_v50 = vpack.c.bf16 %v326_v48, %v324_v45  ;;  %v328_v51 = vadd.f32 %v327_v49, %v78_v33 }
  0xf1   :  { %v329_v52 = vpop.f32.mrf.mxu1 }
  0xf2   :  { %v330_v53 = vadd.f32 %v329_v52, %v82_v37 }
  0xf3   :  { %v333_v54 = vpop.f32.mrf.mxu1 }
  0xf4   :  { %v2864_v55 = vpack.c.bf16 %v330_v53, %v328_v51  ;;  %v334_v56 = vadd.f32 %v333_v54, %v78_v33  ;;  %v2113_v51 = vpack.c.bf16 %v316_v42, %v314_v47 }
  0xf5   :  { %v335_v57 = vpop.f32.mrf.mxu1 }
  0xf6   :  { %v336_v20 = vadd.f32 %v335_v57, %v82_v37  ;;  %v630_v32 = vunpack.c.l.bf16 %v2113_v51 }
  0xf7   :  { %v337_v24 = vpop.f32.mrf.mxu1 }
  0xf8   :  { %v2866_v29 = vpack.c.bf16 %v336_v20, %v334_v56  ;;  %v338_v36 = vadd.f32 %v337_v24, %v78_v33  ;;  %v85_v56 = vsub.s32 2, %v76_v22  ;;  %v631_v24 = vunpack.c.h.bf16 %v2113_v51 }
  0xf9   :  { %v339_v38 = vpop.f32.mrf.mxu1 }
  0xfa   :  { %3473 = vst [vmem:[#allocation5_spill] sm:$0xff] %v2866_v29  ;;  %v340_v40 = vadd.f32 %v339_v38, %v82_v37  ;;  %v89_v38 = vsub.s32 3, %v76_v22  ;;  %v877_v29 = vadd.f32 %v829_v35, %v630_v32 }
  0xfb   :  { %v343_v41 = vpop.f32.mrf.mxu1 }
  0xfc   :  { %v2868_v43 = vpack.c.bf16 %v340_v40, %v338_v36  ;;  %v344_v45 = vadd.f32 %v343_v41, %v78_v33  ;;  %v86_v40 = vrot.slane %v73_v26, %v85_v56  ;;  %v90_v28 = vrot.slane %v73_v26, %v89_v38 }
  0xfd   :  { %v345_v46 = vpop.f32.mrf.mxu1 }
  0xfe   :  { %3474 = vst [vmem:[#allocation6_spill] sm:$0xff] %v2868_v43  ;;  %v346_v48 = vadd.f32 %v345_v46, %v82_v37  ;;  %v878_v43 = vadd.f32 %v831_v39, %v631_v24 }
  0xff   :  { %v347_v49 = vpop.f32.mrf.mxu1 }
 0x100   :  { %v2870_v52 = vpack.c.bf16 %v346_v48, %v344_v45  ;;  %v348_v53 = vadd.f32 %v347_v49, %v78_v33  ;;  %v2077_v33 = vmul.f32 -1.442695, %v878_v43  ;;  %v2076_v49 = vmul.f32 -1.442695, %v877_v29 }
 0x101   :  { %v349_v54 = vpop.f32.mrf.mxu1 }
 0x102   :  { %v350_v57 = vadd.f32 %v349_v54, %v82_v37  ;;  %2281 = vpow2.f32 %v2077_v33 }
 0x103   :  { %v386_v20 = vpop.f32.mrf.mxu1  ;;  %2283 = vpow2.f32 %v2076_v49 }
 0x104   :  { %v2872_v1 = vpack.c.bf16 %v350_v57, %v348_v53  ;;  %v387_v33 = vadd.f32 %v386_v20, %v86_v40 }
 0x105   :  { %v388_v36 = vpop.f32.mrf.mxu1 }
 0x106   :  { %3475 = vst [vmem:[#allocation7_spill] sm:$0xff] %v2872_v1 }
 0x107   :  { %v390_v41 = vpop.f32.mrf.mxu1 }
 0x108   :  { %v391_v46 = vadd.f32 %v390_v41, %v86_v40 }
 0x109   :  { %v392_v42 = vpop.f32.mrf.mxu1 }
 0x10a   :  { %v393_v45 = vadd.f32 %v392_v42, %v90_v28  ;;  %v389_v42 = vadd.f32 %v388_v36, %v90_v28 }
 0x10b   :  { %v396_v47 = vpop.f32.mrf.mxu1 }
 0x10c   :  { %v2874_v48 = vpack.c.bf16 %v393_v45, %v391_v46  ;;  %v397_v37 = vadd.f32 %v396_v47, %v86_v40 }
 0x10d   :  { %v398_v54 = vpop.f32.mrf.mxu1 }
 0x10e   :  { %v399_v53 = vadd.f32 %v398_v54, %v90_v28 }
 0x10f   :  { %v400_v57 = vpop.f32.mrf.mxu1  ;;  %v2282_v54 = vpop.eup %2281 }
 0x110   :  { %v2876_v22 = vpack.c.bf16 %v399_v53, %v397_v37  ;;  %v401_v51 = vadd.f32 %v400_v57, %v86_v40  ;;  %v2284_v57 = vpop.eup %2283 }
 0x111   :  { %v402_v39 = vpop.f32.mrf.mxu1 }
 0x112   :  { %v403_v26 = vadd.f32 %v402_v39, %v90_v28 }
 0x113   :  { %v406_v56 = vpop.f32.mrf.mxu1 }
 0x114   :  { %v2878_v35 = vpack.c.bf16 %v403_v26, %v401_v51  ;;  %v407_v24 = vadd.f32 %v406_v56, %v86_v40  ;;  %v2114_v51 = vpack.c.bf16 %v389_v42, %v387_v33  ;;  %v890_v56 = vadd.f32 1.0, %v2282_v54 }
 0x115   :  { %v408_v38 = vpop.f32.mrf.mxu1 }
 0x116   :  { %v409_v43 = vadd.f32 %v408_v38, %v90_v28  ;;  %v632_v36 = vunpack.c.l.bf16 %v2114_v51  ;;  %2285 = vrcp.f32 %v890_v56 }
 0x117   :  { %v410_v32 = vpop.f32.mrf.mxu1 }
 0x118   :  { %v2880_v41 = vpack.c.bf16 %v409_v43, %v407_v24  ;;  %v411_v29 = vadd.f32 %v410_v32, %v86_v40  ;;  %v884_v43 = vadd.f32 1.0, %v2284_v57 }
 0x119   :  { %v412_v46 = vpop.f32.mrf.mxu1 }
 0x11a   :  { %v413_v45 = vadd.f32 %v412_v46, %v90_v28  ;;  %2287 = vrcp.f32 %v884_v43 }
 0x11b   :  { %v416_v47 = vpop.f32.mrf.mxu1 }
 0x11c   :  { %v2882_v37 = vpack.c.bf16 %v413_v45, %v411_v29  ;;  %v417_v49 = vadd.f32 %v416_v47, %v86_v40  ;;  %v633_v45 = vunpack.c.h.bf16 %v2114_v51 }
 0x11d   :  { %v418_v53 = vpop.f32.mrf.mxu1 }
 0x11e   :  { %v419_v39 = vadd.f32 %v418_v53, %v90_v28 }
 0x11f   :  { %v420_v26 = vpop.f32.mrf.mxu1 }
 0x120   :  { %v2884_v38 = vpack.c.bf16 %v419_v39, %v417_v49  ;;  %v421_v24 = vadd.f32 %v420_v26, %v86_v40 }
 0x121   :  { %v422_v32 = vpop.f32.mrf.mxu1 }
 0x122   :  { %v423_v1 = vadd.f32 %v422_v32, %v90_v28  ;;  %v2891_v32 = vpop.permute.xlu0 %908 }
 0x123   :  { %v870_v46 = vpop.f32.mrf.mxu1  ;;  %v2286_v49 = vpop.eup %2285 }
 0x124   :  { %v2886_v20 = vpack.c.bf16 %v423_v1, %v421_v24  ;;  %v879_v29 = vadd.f32 %v870_v46, %v632_v36  ;;  %v900_v39 = vmul.f32 0.0, %v2286_v49 }
 0x125   :  { %v872_v47 = vpop.f32.mrf.mxu1 }
 0x126   :  { %3476 = vst [vmem:[#allocation8_spill] sm:$0xff] %v2886_v20  ;;  %2289 = vtanh.f32 %v879_v29  ;;  %v880_v42 = vadd.f32 %v872_v47, %v633_v45  ;;  %v3477_v29 = vmov 0   ;;  %v620_v45 = vld [vmem:[%s3462_s1 + $0x10] sm:$0xff]  ;;  %v621_v47 = vld [vmem:[%s3462_s1 + $0x18] sm:$0xff] }
 0x127   :  { %v874_v33 = vpop.f32.mrf.mxu1  ;;  %v2288_v40 = vpop.eup %2287  ;;  %1170 = vperm.xlu1 %2172, %v620_v45   ;;  %v924_v45 = vunpack.c.h.bf16 %v2874_v48 }
 0x128   :  { %v2078_v53 = vmul.f32 -1.442695, %v880_v42  ;;  %v623_v42 = vld [vmem:[%s3462_s1 + $0x28] sm:$0xff]  ;;  %v921_v33 = vunpack.c.l.bf16 %v2860_v44 }
 0x129   :  { %v875_v54 = vpop.f32.mrf.mxu1 }
 0x12a   :  { %2291 = vpow2.f32 %v2078_v53 }
 0x12b   :  { %1301 = vperm.xlu1 %2172, %v621_v47  }
 0x12f   :  { %1563 = vperm.xlu1 %2172, %v623_v42   ;;  %v923_v42 = vunpack.c.l.bf16 %v2874_v48 }
 0x133   :  { %v2290_v57 = vpop.eup %2289 }
 0x134   :  { %v901_v28 = vmul.f32 %v2290_v57, %v2288_v40  ;;  %v922_v40 = vunpack.c.h.bf16 %v2860_v44 }
 0x136   :  { %v2888_v26 = vadd.f32 %v901_v28, %v900_v39 }
 0x137   :  { %v2292_v56 = vpop.eup %2291 }
 0x138   :  { %v897_v1 = vadd.f32 1.0, %v2292_v56  ;;  %2293 = vtanh.f32 %v2888_v26 }
 0x13a   :  { %2295 = vrcp.f32 %v897_v1 }
 0x145   :  { %v2294_v51 = vpop.eup %2293 }
 0x147   :  { %v2296_v24 = vpop.eup %2295 }
 0x148   :  { %v904_v43 = vmul.f32 %v2296_v24, %v2294_v51 }
 0x14a   :  { %v2894_v36 = vmul.f32 %v2891_v32, %v904_v43 }
 0x14c   :  { %v925_v46 = vpack.c.bf16 %v2894_v36, %v2894_v36 }
 0x14e   :  { %959 = vmatmul.mubr.bf16.vlgmr.msra.gmra.mxu0 %v925_v46  ;;  %1000 = vmatmul.mubr.bf16.vlgmr.msra.gmra.mxu1 %v925_v46 }
 0x14f   :  { %1058 = vmatpush1.bf16.msra.mxu0 %v2507_v6  ;;  %1099 = vmatpush1.bf16.msra.mxu1 %v2740_v59 }
 0x150   :  { %1059 = vmatprep.subr.bf16.mxu0 %v2517_v8  ;;  %1100 = vmatprep.subr.bf16.mxu1 %v2747_v60 }
 0x151   :  { %1089 = vmatprep.mubr.bf16.mxu0 %v3477_v29  ;;  %1130 = vmatprep.mubr.bf16.mxu1 %v3477_v29 }
 0x153   :  { %1060 = vmatpush1.bf16.msra.mxu0 %v2522_v9  ;;  %1101 = vmatpush1.bf16.msra.mxu1 %v2755_v61 }
 0x154   :  { %1061 = vmatprep.subr.bf16.mxu0 %v2534_v12  ;;  %1102 = vmatprep.subr.bf16.mxu1 %v2762_v62 }
 0x157   :  { %1062 = vmatpush1.bf16.msra.mxu0 %v2540_v13  ;;  %1103 = vmatpush1.bf16.msra.mxu1 %v2769_v63 }
 0x158   :  { %1063 = vmatprep.subr.bf16.mxu0 %v2549_v15  ;;  %1104 = vmatprep.subr.bf16.mxu1 %v2775_v0 }
 0x15b   :  { %1064 = vmatpush1.bf16.msra.mxu0 %v2558_v17  ;;  %1105 = vmatpush1.bf16.msra.mxu1 %v2782_v2 }
 0x15c   :  { %1065 = vmatprep.subr.bf16.mxu0 %v2567_v19  ;;  %1106 = vmatprep.subr.bf16.mxu1 %v2789_v3 }
 0x15f   :  { %1066 = vmatpush1.bf16.msra.mxu0 %v2576_v21  ;;  %1107 = vmatpush1.bf16.msra.mxu1 %v2795_v4 }
 0x160   :  { %1067 = vmatprep.subr.bf16.mxu0 %v2585_v23  ;;  %1108 = vmatprep.subr.bf16.mxu1 %v2801_v7 }
 0x163   :  { %1068 = vmatpush1.bf16.msra.mxu0 %v2594_v25  ;;  %1109 = vmatpush1.bf16.msra.mxu1 %v2808_v10 }
 0x164   :  { %1069 = vmatprep.subr.bf16.mxu0 %v2603_v27  ;;  %1110 = vmatprep.subr.bf16.mxu1 %v2815_v11 }
 0x167   :  { %1070 = vmatpush1.bf16.msra.mxu0 %v2615_v30  ;;  %1111 = vmatpush1.bf16.msra.mxu1 %v2821_v14 }
 0x168   :  { %1071 = vmatprep.subr.bf16.mxu0 %v2621_v31  ;;  %1112 = vmatprep.subr.bf16.mxu1 %v2827_v16 }
 0x16b   :  { %1072 = vmatpush1.bf16.msra.mxu0 %v2635_v34  ;;  %1113 = vmatpush1.bf16.msra.mxu1 %v2833_v18 }
 0x16c   :  { %1188 = vmatprep.subr.bf16.mxu0 %v2502_v5  ;;  %1229 = vmatprep.subr.bf16.mxu1 %v2733_v58  ;;  %v625_v5 = vld [vmem:[%s3462_s1 + $0x38] sm:$0xff] }
 0x16d   :  { %1825 = vperm.xlu1 %2172, %v625_v5  }
 0x20e   :  { %v960_v53 = vpop.f32.mrf.mxu0  ;;  %v1001_v54 = vpop.f32.mrf.mxu1 }
 0x20f   :  { %v1008_v49 = vadd.f32 %v960_v53, %v921_v33  ;;  %v1010_v5 = vadd.f32 %v1001_v54, %v923_v42 }
 0x210   :  { %v962_v57 = vpop.f32.mrf.mxu0  ;;  %v1003_v39 = vpop.f32.mrf.mxu1 }
 0x211   :  { %v2079_v28 = vmul.f32 -1.442695, %v1008_v49  ;;  %v1009_v56 = vadd.f32 %v962_v57, %v922_v40  ;;  %v1011_v47 = vadd.f32 %v1003_v39, %v924_v45 }
 0x212   :  { %v964_v1 = vpop.f32.mrf.mxu0  ;;  %v1005_v51 = vpop.f32.mrf.mxu1 }
 0x213   :  { %2297 = vpow2.f32 %v2079_v28  ;;  %v2080_v24 = vmul.f32 -1.442695, %v1009_v56  ;;  %v2081_v33 = vmul.f32 -1.442695, %v1011_v47  ;;  %v914_v56 = vmul.f32 %v2891_v32, %v2888_v26 }
 0x214   :  { %v965_v43 = vpop.f32.mrf.mxu0  ;;  %v1006_v46 = vpop.f32.mrf.mxu1 }
 0x215   :  { %2299 = vpow2.f32 %v2080_v24  ;;  %v2950_v43 = vpop.permute.xlu0 %1039 }
 0x216   :  { %2301 = vtanh.f32 %v1010_v5 }
 0x217   :  { %2303 = vpow2.f32 %v2081_v33 }
 0x220   :  { %v2298_v53 = vpop.eup %2297 }
 0x221   :  { %v1015_v44 = vadd.f32 1.0, %v2298_v53 }
 0x222   :  { %v2300_v20 = vpop.eup %2299 }
 0x223   :  { %2305 = vrcp.f32 %v1015_v44  ;;  %v1021_v49 = vadd.f32 1.0, %v2300_v20  ;;  %v2302_v40 = vpop.eup %2301  ;;  %v1055_v44 = vunpack.c.h.bf16 %v2876_v22 }
 0x224   :  { %v2304_v57 = vpop.eup %2303 }
 0x225   :  { %2307 = vrcp.f32 %v1021_v49  ;;  %v1028_v51 = vadd.f32 1.0, %v2304_v57 }
 0x227   :  { %2309 = vrcp.f32 %v1028_v51 }
 0x230   :  { %v2306_v28 = vpop.eup %2305 }
 0x231   :  { %v1032_v1 = vmul.f32 %v2306_v28, %v2302_v40  ;;  %v1054_v40 = vunpack.c.l.bf16 %v2876_v22  ;;  %v3009_v22 = vpop.permute.xlu1 %1170 }
 0x232   :  { %v2308_v39 = vpop.eup %2307 }
 0x233   :  { %v1031_v48 = vmul.f32 %v2308_v39, %v914_v56 }
 0x234   :  { %v2310_v45 = vpop.eup %2309 }
 0x235   :  { %v1033_v54 = vadd.f32 %v1032_v1, %v1031_v48 }
 0x237   :  { %2311 = vtanh.f32 %v1033_v54  ;;  %v1044_v24 = vsub.f32 %v1033_v54, %v914_v56 }
 0x239   :  { %v1045_v46 = vmul.f32 %v1044_v24, %v2950_v43 }
 0x23b   :  { %v2953_v20 = vadd.f32 %v1045_v46, %v914_v56 }
 0x244   :  { %v2312_v47 = vpop.eup %2311 }
 0x245   :  { %v2955_v42 = vmul.f32 %v2312_v47, %v2310_v45 }
 0x247   :  { %v1036_v26 = vsub.f32 %v2955_v42, %v2894_v36 }
 0x249   :  { %v1042_v32 = vmul.f32 %v2950_v43, %v1036_v26 }
 0x24b   :  { %v2961_v5 = vadd.f32 %v1042_v32, %v2894_v36 }
 0x24d   :  { %v1056_v33 = vpack.c.bf16 %v2961_v5, %v2961_v5 }
 0x24f   :  { %1090 = vmatmul.mubr.bf16.vlgmr.msra.gmra.mxu0 %v1056_v33  ;;  %1131 = vmatmul.mubr.bf16.vlgmr.msra.gmra.mxu1 %v1056_v33 }
 0x250   :  { %1189 = vmatpush1.bf16.msra.mxu0 %v2507_v6  ;;  %1230 = vmatpush1.bf16.msra.mxu1 %v2740_v59  ;;  %v3000_v6 = vld [vmem:[%s3460_s3 + $0xe4] ss:$16 sps:$4 sm:$0xff]  }
 0x251   :  { %1190 = vmatprep.subr.bf16.mxu0 %v2517_v8  ;;  %1231 = vmatprep.subr.bf16.mxu1 %v2747_v60  ;;  %v1052_v8 = vunpack.c.l.bf16 %v2862_v50 }
 0x252   :  { %1220 = vmatprep.mubr.bf16.mxu0 %v3477_v29  ;;  %1261 = vmatprep.mubr.bf16.mxu1 %v3477_v29 }
 0x254   :  { %1191 = vmatpush1.bf16.msra.mxu0 %v2522_v9  ;;  %1232 = vmatpush1.bf16.msra.mxu1 %v2755_v61 }
 0x255   :  { %1192 = vmatprep.subr.bf16.mxu0 %v2534_v12  ;;  %1233 = vmatprep.subr.bf16.mxu1 %v2762_v62 }
 0x258   :  { %1193 = vmatpush1.bf16.msra.mxu0 %v2540_v13  ;;  %1234 = vmatpush1.bf16.msra.mxu1 %v2769_v63 }
 0x259   :  { %1194 = vmatprep.subr.bf16.mxu0 %v2549_v15  ;;  %1235 = vmatprep.subr.bf16.mxu1 %v2775_v0  ;;  %v1053_v15 = vunpack.c.h.bf16 %v2862_v50 }
 0x25c   :  { %1195 = vmatpush1.bf16.msra.mxu0 %v2558_v17  ;;  %1236 = vmatpush1.bf16.msra.mxu1 %v2782_v2 }
 0x25d   :  { %1196 = vmatprep.subr.bf16.mxu0 %v2567_v19  ;;  %1237 = vmatprep.subr.bf16.mxu1 %v2789_v3 }
 0x260   :  { %1197 = vmatpush1.bf16.msra.mxu0 %v2576_v21  ;;  %1238 = vmatpush1.bf16.msra.mxu1 %v2795_v4 }
 0x261   :  { %1198 = vmatprep.subr.bf16.mxu0 %v2585_v23  ;;  %1239 = vmatprep.subr.bf16.mxu1 %v2801_v7 }
 0x264   :  { %1199 = vmatpush1.bf16.msra.mxu0 %v2594_v25  ;;  %1240 = vmatpush1.bf16.msra.mxu1 %v2808_v10 }
 0x265   :  { %1200 = vmatprep.subr.bf16.mxu0 %v2603_v27  ;;  %1241 = vmatprep.subr.bf16.mxu1 %v2815_v11 }
 0x268   :  { %1201 = vmatpush1.bf16.msra.mxu0 %v2615_v30  ;;  %1242 = vmatpush1.bf16.msra.mxu1 %v2821_v14 }
 0x269   :  { %1202 = vmatprep.subr.bf16.mxu0 %v2621_v31  ;;  %1243 = vmatprep.subr.bf16.mxu1 %v2827_v16 }
 0x26c   :  { %1203 = vmatpush1.bf16.msra.mxu0 %v2635_v34  ;;  %1244 = vmatpush1.bf16.msra.mxu1 %v2833_v18 }
 0x26d   :  { %1319 = vmatprep.subr.bf16.mxu0 %v3000_v6  ;;  %1360 = vmatprep.subr.bf16.mxu1 %v2733_v58 }
 0x30f   :  { %v1091_v9 = vpop.f32.mrf.mxu0  ;;  %v1132_v12 = vpop.f32.mrf.mxu1 }
 0x310   :  { %v1139_v13 = vadd.f32 %v1091_v9, %v1052_v8  ;;  %v1141_v57 = vadd.f32 %v1132_v12, %v1054_v40  ;;  %v3101_v40 = vld [vmem:[%s3460_s3 + $0x40] ss:$16 sps:$4 sm:$0xff]  }
 0x311   :  { %v1093_v17 = vpop.f32.mrf.mxu0  ;;  %v1134_v19 = vpop.f32.mrf.mxu1 }
 0x312   :  { %v2082_v21 = vmul.f32 -1.442695, %v1139_v13  ;;  %v1140_v23 = vadd.f32 %v1093_v17, %v1053_v15  ;;  %v1142_v49 = vadd.f32 %v1134_v19, %v1055_v44  ;;  %v3087_v44 = vld [vmem:[%s3460_s3 + $0x60] ss:$16 sps:$4 sm:$0xff]  }
 0x313   :  { %v1095_v25 = vpop.f32.mrf.mxu0  ;;  %v1136_v27 = vpop.f32.mrf.mxu1 }
 0x314   :  { %2313 = vpow2.f32 %v2082_v21  ;;  %v2083_v30 = vmul.f32 -1.442695, %v1140_v23  ;;  %v2084_v28 = vmul.f32 -1.442695, %v1142_v49  ;;  %v3036_v23 = vld [vmem:[%s3460_s3 + $0xc4] ss:$16 sps:$4 sm:$0xff]  }
 0x315   :  { %v1096_v31 = vpop.f32.mrf.mxu0  ;;  %v1137_v53 = vpop.f32.mrf.mxu1  ;;  %v3052_v25 = vld [vmem:[%s3460_s3 + $0xa4] ss:$16 sps:$4 sm:$0xff]   ;;  %v3059_v27 = vld [vmem:[%s3460_s3 + $0xa0] ss:$16 sps:$4 sm:$0xff]  }
 0x316   :  { %2315 = vpow2.f32 %v2083_v30  ;;  %v3066_v30 = vld [vmem:[%s3460_s3 + $0x84] ss:$16 sps:$4 sm:$0xff]   ;;  %v3073_v31 = vld [vmem:[%s3460_s3 + $0x80] ss:$16 sps:$4 sm:$0xff]  }
 0x317   :  { %2317 = vtanh.f32 %v1141_v57  ;;  %v3080_v53 = vld [vmem:[%s3460_s3 + $0x64] ss:$16 sps:$4 sm:$0xff]  }
 0x318   :  { %2319 = vpow2.f32 %v2084_v28  ;;  %v3094_v49 = vld [vmem:[%s3460_s3 + $0x44] ss:$16 sps:$4 sm:$0xff]   ;;  %v3115_v28 = vld [vmem:[%s3460_s3 + $0x20] ss:$16 sps:$4 sm:$0xff]  }
 0x319   :  { %v3108_v57 = vld [vmem:[%s3460_s3 + $0x24] ss:$16 sps:$4 sm:$0xff]  }
 0x321   :  { %v2314_v56 = vpop.eup %2313 }
 0x322   :  { %v1146_v50 = vadd.f32 1.0, %v2314_v56  ;;  %v3122_v56 = vld [vmem:[%s3460_s3 + $0x4] ss:$16 sps:$4 sm:$0xff]  }
 0x323   :  { %v2316_v1 = vpop.eup %2315 }
 0x324   :  { %2321 = vrcp.f32 %v1146_v50  ;;  %v1152_v39 = vadd.f32 1.0, %v2316_v1  ;;  %v2318_v51 = vpop.eup %2317  ;;  %v1183_v50 = vunpack.c.l.bf16 %v2864_v55 }
 0x325   :  { %v2320_v48 = vpop.eup %2319 }
 0x326   :  { %2323 = vrcp.f32 %v1152_v39  ;;  %v1159_v45 = vadd.f32 1.0, %v2320_v48  ;;  %v1184_v48 = vunpack.c.h.bf16 %v2864_v55 }
 0x328   :  { %2325 = vrcp.f32 %v1159_v45 }
 0x331   :  { %v2322_v54 = vpop.eup %2321 }
 0x332   :  { %v1163_v24 = vmul.f32 %v2322_v54, %v2318_v51 }
 0x333   :  { %v2324_v46 = vpop.eup %2323 }
 0x334   :  { %v1162_v47 = vmul.f32 %v2324_v46, %v2953_v20 }
 0x335   :  { %v2326_v9 = vpop.eup %2325 }
 0x336   :  { %v1164_v26 = vadd.f32 %v1163_v24, %v1162_v47 }
 0x338   :  { %2327 = vtanh.f32 %v1164_v26  ;;  %v1175_v32 = vsub.f32 %v1164_v26, %v2953_v20 }
 0x33a   :  { %v1176_v33 = vmul.f32 %v1175_v32, %v3009_v22 }
 0x33c   :  { %v3014_v8 = vadd.f32 %v1176_v33, %v2953_v20  ;;  %v3029_v20 = vld [vmem:[%s3460_s3 + $0xe0] ss:$16 sps:$4 sm:$0xff]  }
 0x345   :  { %v2328_v12 = vpop.eup %2327 }
 0x346   :  { %v3016_v13 = vmul.f32 %v2328_v12, %v2326_v9  ;;  %v1186_v9 = vunpack.c.h.bf16 %v2878_v35 }
 0x348   :  { %v1167_v15 = vsub.f32 %v3016_v13, %v2961_v5 }
 0x34a   :  { %v1173_v17 = vmul.f32 %v3009_v22, %v1167_v15  ;;  %v1185_v15 = vunpack.c.l.bf16 %v2878_v35 }
 0x34c   :  { %v3022_v19 = vadd.f32 %v1173_v17, %v2961_v5  ;;  %v3045_v5 = vld [vmem:[%s3460_s3 + $0xc0] ss:$16 sps:$4 sm:$0xff]  }
 0x34e   :  { %v1187_v21 = vpack.c.bf16 %v3022_v19, %v3022_v19 }
 0x350   :  { %1221 = vmatmul.mubr.bf16.vlgmr.msra.gmra.mxu0 %v1187_v21  ;;  %1262 = vmatmul.mubr.bf16.vlgmr.msra.gmra.mxu1 %v1187_v21 }
 0x351   :  { %1320 = vmatpush1.bf16.msra.mxu0 %v3029_v20  ;;  %1361 = vmatpush1.bf16.msra.mxu1 %v2740_v59 }
 0x352   :  { %1321 = vmatprep.subr.bf16.mxu0 %v3036_v23  ;;  %1362 = vmatprep.subr.bf16.mxu1 %v2747_v60 }
 0x353   :  { %1351 = vmatprep.mubr.bf16.mxu0 %v3477_v29  ;;  %1392 = vmatprep.mubr.bf16.mxu1 %v3477_v29 }
 0x355   :  { %1322 = vmatpush1.bf16.msra.mxu0 %v3045_v5  ;;  %1363 = vmatpush1.bf16.msra.mxu1 %v2755_v61 }
 0x356   :  { %1323 = vmatprep.subr.bf16.mxu0 %v3052_v25  ;;  %1364 = vmatprep.subr.bf16.mxu1 %v2762_v62 }
 0x359   :  { %1324 = vmatpush1.bf16.msra.mxu0 %v3059_v27  ;;  %1365 = vmatpush1.bf16.msra.mxu1 %v2769_v63 }
 0x35a   :  { %1325 = vmatprep.subr.bf16.mxu0 %v3066_v30  ;;  %1366 = vmatprep.subr.bf16.mxu1 %v2775_v0 }
 0x35d   :  { %1326 = vmatpush1.bf16.msra.mxu0 %v3073_v31  ;;  %1367 = vmatpush1.bf16.msra.mxu1 %v2782_v2 }
 0x35e   :  { %1327 = vmatprep.subr.bf16.mxu0 %v3080_v53  ;;  %1368 = vmatprep.subr.bf16.mxu1 %v2789_v3 }
 0x361   :  { %1328 = vmatpush1.bf16.msra.mxu0 %v3087_v44  ;;  %1369 = vmatpush1.bf16.msra.mxu1 %v2795_v4 }
 0x362   :  { %1329 = vmatprep.subr.bf16.mxu0 %v3094_v49  ;;  %1370 = vmatprep.subr.bf16.mxu1 %v2801_v7 }
 0x365   :  { %1330 = vmatpush1.bf16.msra.mxu0 %v3101_v40  ;;  %1371 = vmatpush1.bf16.msra.mxu1 %v2808_v10 }
 0x366   :  { %1331 = vmatprep.subr.bf16.mxu0 %v3108_v57  ;;  %1372 = vmatprep.subr.bf16.mxu1 %v2815_v11 }
 0x369   :  { %1332 = vmatpush1.bf16.msra.mxu0 %v3115_v28  ;;  %1373 = vmatpush1.bf16.msra.mxu1 %v2821_v14 }
 0x36a   :  { %1333 = vmatprep.subr.bf16.mxu0 %v3122_v56  ;;  %1374 = vmatprep.subr.bf16.mxu1 %v2827_v16 }
 0x36d   :  { %1334 = vmatpush1.bf16.msra.mxu0 %v2635_v34  ;;  %1375 = vmatpush1.bf16.msra.mxu1 %v2833_v18 }
 0x36e   :  { %1450 = vmatprep.subr.bf16.mxu0 %v3000_v6  ;;  %1491 = vmatprep.subr.bf16.mxu1 %v2733_v58 }
 0x410   :  { %v1222_v1 = vpop.f32.mrf.mxu0  ;;  %v1263_v39 = vpop.f32.mrf.mxu1 }
 0x411   :  { %v1270_v51 = vadd.f32 %v1222_v1, %v1183_v50  ;;  %v1272_v17 = vadd.f32 %v1263_v39, %v1185_v15  ;;  %v1302_v39 = vpop.permute.xlu1 %1301 }
 0x412   :  { %v1224_v54 = vpop.f32.mrf.mxu0  ;;  %v1265_v24 = vpop.f32.mrf.mxu1 }
 0x413   :  { %v2085_v46 = vmul.f32 -1.442695, %v1270_v51  ;;  %v1271_v45 = vadd.f32 %v1224_v54, %v1184_v48  ;;  %v1273_v12 = vadd.f32 %v1265_v24, %v1186_v9 }
 0x414   :  { %v1226_v47 = vpop.f32.mrf.mxu0  ;;  %v1267_v26 = vpop.f32.mrf.mxu1 }
 0x415   :  { %2329 = vpow2.f32 %v2085_v46  ;;  %v2086_v34 = vmul.f32 -1.442695, %v1271_v45  ;;  %v2087_v21 = vmul.f32 -1.442695, %v1273_v12 }
 0x416   :  { %v1227_v32 = vpop.f32.mrf.mxu0  ;;  %v1268_v33 = vpop.f32.mrf.mxu1 }
 0x417   :  { %2331 = vpow2.f32 %v2086_v34 }
 0x418   :  { %2333 = vtanh.f32 %v1272_v17  ;;  %v3141_v17 = vmul.f32 %v3009_v22, %v3016_v13 }
 0x419   :  { %2335 = vpow2.f32 %v2087_v21 }
 0x422   :  { %v2330_v50 = vpop.eup %2329 }
 0x423   :  { %v1277_v55 = vadd.f32 1.0, %v2330_v50 }
 0x424   :  { %v2332_v1 = vpop.eup %2331 }
 0x425   :  { %2337 = vrcp.f32 %v1277_v55  ;;  %v1283_v51 = vadd.f32 1.0, %v2332_v1  ;;  %v2334_v48 = vpop.eup %2333 }
 0x426   :  { %v2336_v54 = vpop.eup %2335 }
 0x427   :  { %2339 = vrcp.f32 %v1283_v51  ;;  %v1290_v26 = vadd.f32 1.0, %v2336_v54 }
 0x429   :  { %2341 = vrcp.f32 %v1290_v26 }
 0x432   :  { %v2338_v46 = vpop.eup %2337 }
 0x433   :  { %v1294_v45 = vmul.f32 %v2338_v46, %v2334_v48 }
 0x434   :  { %v2340_v47 = vpop.eup %2339 }
 0x435   :  { %v1293_v24 = vmul.f32 %v2340_v47, %v3014_v8 }
 0x436   :  { %v2342_v9 = vpop.eup %2341 }
 0x437   :  { %v1295_v34 = vadd.f32 %v1294_v45, %v1293_v24 }
 0x439   :  { %2343 = vtanh.f32 %v1295_v34  ;;  %v1306_v35 = vsub.f32 %v1295_v34, %v3014_v8 }
 0x43b   :  { %v1307_v32 = vmul.f32 %v1306_v35, %v1302_v39 }
 0x43d   :  { %v3137_v33 = vadd.f32 %v1307_v32, %v3014_v8 }
 0x446   :  { %v2344_v12 = vpop.eup %2343 }
 0x447   :  { %v1297_v15 = vmul.f32 %v2344_v12, %v2342_v9 }
 0x449   :  { %v1298_v21 = vsub.f32 %v1297_v15, %v3022_v19  ;;  %v3144_v50 = vmul.f32 %v1302_v39, %v1297_v15 }
 0x44b   :  { %v1304_v55 = vmul.f32 %v1302_v39, %v1298_v21  ;;  %v2130_v1 = vpack.c.bf16 %v3144_v50, %v3141_v17  ;;  %v3198_v21 = vpop.permute.xlu0 %1432 }
 0x44d   :  { %v3149_v51 = vadd.f32 %v1304_v55, %v3022_v19  ;;  %v1316_v19 = vunpack.c.l.bf16 %v2880_v41 }
 0x44f   :  { %v1318_v8 = vpack.c.bf16 %v3149_v51, %v3149_v51 }
 0x451   :  { %1352 = vmatmul.mubr.bf16.vlgmr.msra.gmra.mxu0 %v1318_v8  ;;  %1393 = vmatmul.mubr.bf16.vlgmr.msra.gmra.mxu1 %v1318_v8 }
 0x452   :  { %1451 = vmatpush1.bf16.msra.mxu0 %v3029_v20  ;;  %1492 = vmatpush1.bf16.msra.mxu1 %v2740_v59  ;;  %v3186_v59 = vld [vmem:[%s3460_s3] ss:$16 sps:$4 sm:$0xff]  }
 0x453   :  { %1452 = vmatprep.subr.bf16.mxu0 %v3036_v23  ;;  %1493 = vmatprep.subr.bf16.mxu1 %v2747_v60  ;;  %v3478_v60 = vld [vmem:[#allocation5_spill] sm:$0xff] }
 0x454   :  { %1482 = vmatprep.mubr.bf16.mxu0 %v3477_v29  ;;  %1523 = vmatprep.mubr.bf16.mxu1 %v3477_v29 }
 0x456   :  { %1453 = vmatpush1.bf16.msra.mxu0 %v3045_v5  ;;  %1494 = vmatpush1.bf16.msra.mxu1 %v2755_v61  ;;  %v1314_v61 = vunpack.c.l.bf16 %v3478_v60 }
 0x457   :  { %1454 = vmatprep.subr.bf16.mxu0 %v3052_v25  ;;  %1495 = vmatprep.subr.bf16.mxu1 %v2762_v62 }
 0x45a   :  { %1455 = vmatpush1.bf16.msra.mxu0 %v3059_v27  ;;  %1496 = vmatpush1.bf16.msra.mxu1 %v2769_v63 }
 0x45b   :  { %1456 = vmatprep.subr.bf16.mxu0 %v3066_v30  ;;  %1497 = vmatprep.subr.bf16.mxu1 %v2775_v0 }
 0x45e   :  { %1457 = vmatpush1.bf16.msra.mxu0 %v3073_v31  ;;  %1498 = vmatpush1.bf16.msra.mxu1 %v2782_v2  ;;  %v1315_v2 = vunpack.c.h.bf16 %v3478_v60 }
 0x45f   :  { %1458 = vmatprep.subr.bf16.mxu0 %v3080_v53  ;;  %1499 = vmatprep.subr.bf16.mxu1 %v2789_v3 }
 0x462   :  { %1459 = vmatpush1.bf16.msra.mxu0 %v3087_v44  ;;  %1500 = vmatpush1.bf16.msra.mxu1 %v2795_v4 }
 0x463   :  { %1460 = vmatprep.subr.bf16.mxu0 %v3094_v49  ;;  %1501 = vmatprep.subr.bf16.mxu1 %v2801_v7 }
 0x466   :  { %1461 = vmatpush1.bf16.msra.mxu0 %v3101_v40  ;;  %1502 = vmatpush1.bf16.msra.mxu1 %v2808_v10 }
 0x467   :  { %1462 = vmatprep.subr.bf16.mxu0 %v3108_v57  ;;  %1503 = vmatprep.subr.bf16.mxu1 %v2815_v11 }
 0x46a   :  { %1463 = vmatpush1.bf16.msra.mxu0 %v3115_v28  ;;  %1504 = vmatpush1.bf16.msra.mxu1 %v2821_v14 }
 0x46b   :  { %1464 = vmatprep.subr.bf16.mxu0 %v3122_v56  ;;  %1505 = vmatprep.subr.bf16.mxu1 %v2827_v16 }
 0x46e   :  { %1465 = vmatpush1.bf16.msra.mxu0 %v3186_v59  ;;  %1506 = vmatpush1.bf16.msra.mxu1 %v2833_v18 }
 0x46f   :  { %1581 = vmatprep.subr.bf16.mxu0 %v3000_v6  ;;  %1622 = vmatprep.subr.bf16.mxu1 %v2733_v58  ;;  %v1317_v58 = vunpack.c.h.bf16 %v2880_v41 }
 0x511   :  { %v1353_v62 = vpop.f32.mrf.mxu0  ;;  %v1394_v63 = vpop.f32.mrf.mxu1 }
 0x512   :  { %v1401_v0 = vadd.f32 %v1353_v62, %v1314_v61  ;;  %v1403_v48 = vadd.f32 %v1394_v63, %v1316_v19  ;;  %v3304_v19 = vld [vmem:[%s3460_s3 + $0x28] ss:$16 sps:$4 sm:$0xff]  }
 0x513   :  { %v1355_v3 = vpop.f32.mrf.mxu0  ;;  %v1396_v4 = vpop.f32.mrf.mxu1 }
 0x514   :  { %v2088_v7 = vmul.f32 -1.442695, %v1401_v0  ;;  %v1402_v10 = vadd.f32 %v1355_v3, %v1315_v2  ;;  %v1404_v13 = vadd.f32 %v1396_v4, %v1317_v58  ;;  %v3234_v4 = vld [vmem:[%s3460_s3 + $0xc8] ss:$16 sps:$4 sm:$0xff]  }
 0x515   :  { %v1357_v11 = vpop.f32.mrf.mxu0  ;;  %v1398_v14 = vpop.f32.mrf.mxu1  ;;  %v3290_v58 = vld [vmem:[%s3460_s3 + $0x48] ss:$16 sps:$4 sm:$0xff]  }
 0x516   :  { %2345 = vpow2.f32 %v2088_v7  ;;  %v2089_v16 = vmul.f32 -1.442695, %v1402_v10  ;;  %v2090_v54 = vmul.f32 -1.442695, %v1404_v13  ;;  %v3241_v7 = vld [vmem:[%s3460_s3 + $0xac] ss:$16 sps:$4 sm:$0xff]  }
 0x517   :  { %v1358_v18 = vpop.f32.mrf.mxu0  ;;  %v1399_v22 = vpop.f32.mrf.mxu1  ;;  %v3248_v10 = vld [vmem:[%s3460_s3 + $0xa8] ss:$16 sps:$4 sm:$0xff]   ;;  %v3255_v11 = vld [vmem:[%s3460_s3 + $0x8c] ss:$16 sps:$4 sm:$0xff]  }
 0x518   :  { %2347 = vpow2.f32 %v2089_v16  ;;  %v3262_v14 = vld [vmem:[%s3460_s3 + $0x88] ss:$16 sps:$4 sm:$0xff]   ;;  %v3269_v16 = vld [vmem:[%s3460_s3 + $0x6c] ss:$16 sps:$4 sm:$0xff]  }
 0x519   :  { %2349 = vtanh.f32 %v1403_v48  ;;  %v3276_v18 = vld [vmem:[%s3460_s3 + $0x68] ss:$16 sps:$4 sm:$0xff]   ;;  %v3283_v22 = vld [vmem:[%s3460_s3 + $0x4c] ss:$16 sps:$4 sm:$0xff]  }
 0x51a   :  { %2351 = vpow2.f32 %v2090_v54  ;;  %v3297_v13 = vld [vmem:[%s3460_s3 + $0x2c] ss:$16 sps:$4 sm:$0xff]   ;;  %v3318_v54 = vld [vmem:[%s3460_s3 + $0x8] ss:$16 sps:$4 sm:$0xff]  }
 0x51b   :  { %v3311_v48 = vld [vmem:[%s3460_s3 + $0xc] ss:$16 sps:$4 sm:$0xff]  }
 0x523   :  { %v2346_v46 = vpop.eup %2345 }
 0x524   :  { %v1408_v45 = vadd.f32 1.0, %v2346_v46  ;;  %v2440_v46 = vld [vmem:[%s3460_s3 + $0xec] ss:$16 sps:$4 sm:$0xff]  }
 0x525   :  { %v2348_v47 = vpop.eup %2347 }
 0x526   :  { %2353 = vrcp.f32 %v1408_v45  ;;  %v1414_v26 = vadd.f32 1.0, %v2348_v47  ;;  %v2350_v24 = vpop.eup %2349  ;;  %v3479_v45 = vld [vmem:[#allocation6_spill] sm:$0xff] }
 0x527   :  { %v2352_v34 = vpop.eup %2351  ;;  %v1445_v47 = vunpack.c.l.bf16 %v3479_v45 }
 0x528   :  { %2355 = vrcp.f32 %v1414_v26  ;;  %v1421_v9 = vadd.f32 1.0, %v2352_v34 }
 0x52a   :  { %2357 = vrcp.f32 %v1421_v9 }
 0x533   :  { %v2354_v35 = vpop.eup %2353 }
 0x534   :  { %v1425_v39 = vmul.f32 %v2354_v35, %v2350_v24  ;;  %v1446_v35 = vunpack.c.h.bf16 %v3479_v45 }
 0x535   :  { %v2356_v32 = vpop.eup %2355 }
 0x536   :  { %v1424_v12 = vmul.f32 %v2356_v32, %v3137_v33 }
 0x537   :  { %v2358_v60 = vpop.eup %2357 }
 0x538   :  { %v1426_v15 = vadd.f32 %v1425_v39, %v1424_v12 }
 0x53a   :  { %2359 = vtanh.f32 %v1426_v15  ;;  %v1437_v41 = vsub.f32 %v1426_v15, %v3137_v33 }
 0x53c   :  { %v1438_v55 = vmul.f32 %v1437_v41, %v3198_v21 }
 0x53e   :  { %v3202_v8 = vadd.f32 %v1438_v55, %v3137_v33  ;;  %v3218_v33 = vld [vmem:[%s3460_s3 + $0xe8] ss:$16 sps:$4 sm:$0xff]  }
 0x547   :  { %v2360_v61 = vpop.eup %2359 }
 0x548   :  { %v3204_v62 = vmul.f32 %v2360_v61, %v2358_v60  ;;  %v1448_v61 = vunpack.c.h.bf16 %v2882_v37 }
 0x54a   :  { %v1429_v63 = vsub.f32 %v3204_v62, %v3149_v51 }
 0x54c   :  { %v1435_v0 = vmul.f32 %v3198_v21, %v1429_v63 }
 0x54e   :  { %v3210_v2 = vadd.f32 %v1435_v0, %v3149_v51  ;;  %v3225_v51 = vld [vmem:[%s3460_s3 + $0xcc] ss:$16 sps:$4 sm:$0xff]   ;;  %v1447_v0 = vunpack.c.l.bf16 %v2882_v37 }
 0x550   :  { %v1449_v3 = vpack.c.bf16 %v3210_v2, %v3210_v2 }
 0x552   :  { %1483 = vmatmul.mubr.bf16.vlgmr.msra.gmra.mxu0 %v1449_v3  ;;  %1524 = vmatmul.mubr.bf16.vlgmr.msra.gmra.mxu1 %v1449_v3 }
 0x553   :  { %1582 = vmatpush1.bf16.msra.mxu0 %v3029_v20  ;;  %1623 = vmatpush1.bf16.msra.mxu1 %v3218_v33 }
 0x554   :  { %1583 = vmatprep.subr.bf16.mxu0 %v3036_v23  ;;  %1624 = vmatprep.subr.bf16.mxu1 %v3225_v51 }
 0x555   :  { %1613 = vmatprep.mubr.bf16.mxu0 %v3477_v29  ;;  %1654 = vmatprep.mubr.bf16.mxu1 %v3477_v29 }
 0x557   :  { %1584 = vmatpush1.bf16.msra.mxu0 %v3045_v5  ;;  %1625 = vmatpush1.bf16.msra.mxu1 %v3234_v4 }
 0x558   :  { %1585 = vmatprep.subr.bf16.mxu0 %v3052_v25  ;;  %1626 = vmatprep.subr.bf16.mxu1 %v3241_v7 }
 0x55b   :  { %1586 = vmatpush1.bf16.msra.mxu0 %v3059_v27  ;;  %1627 = vmatpush1.bf16.msra.mxu1 %v3248_v10 }
 0x55c   :  { %1587 = vmatprep.subr.bf16.mxu0 %v3066_v30  ;;  %1628 = vmatprep.subr.bf16.mxu1 %v3255_v11 }
 0x55f   :  { %1588 = vmatpush1.bf16.msra.mxu0 %v3073_v31  ;;  %1629 = vmatpush1.bf16.msra.mxu1 %v3262_v14 }
 0x560   :  { %1589 = vmatprep.subr.bf16.mxu0 %v3080_v53  ;;  %1630 = vmatprep.subr.bf16.mxu1 %v3269_v16 }
 0x563   :  { %1590 = vmatpush1.bf16.msra.mxu0 %v3087_v44  ;;  %1631 = vmatpush1.bf16.msra.mxu1 %v3276_v18 }
 0x564   :  { %1591 = vmatprep.subr.bf16.mxu0 %v3094_v49  ;;  %1632 = vmatprep.subr.bf16.mxu1 %v3283_v22 }
 0x567   :  { %1592 = vmatpush1.bf16.msra.mxu0 %v3101_v40  ;;  %1633 = vmatpush1.bf16.msra.mxu1 %v3290_v58 }
 0x568   :  { %1593 = vmatprep.subr.bf16.mxu0 %v3108_v57  ;;  %1634 = vmatprep.subr.bf16.mxu1 %v3297_v13 }
 0x56b   :  { %1594 = vmatpush1.bf16.msra.mxu0 %v3115_v28  ;;  %1635 = vmatpush1.bf16.msra.mxu1 %v3304_v19 }
 0x56c   :  { %1595 = vmatprep.subr.bf16.mxu0 %v3122_v56  ;;  %1636 = vmatprep.subr.bf16.mxu1 %v3311_v48 }
 0x56f   :  { %1596 = vmatpush1.bf16.msra.mxu0 %v3186_v59  ;;  %1637 = vmatpush1.bf16.msra.mxu1 %v3318_v54 }
 0x570   :  { %1712 = vmatprep.subr.bf16.mxu0 %v3000_v6  ;;  %1753 = vmatprep.subr.bf16.mxu1 %v2440_v46 }
 0x612   :  { %v1484_v26 = vpop.f32.mrf.mxu0  ;;  %v1525_v24 = vpop.f32.mrf.mxu1 }
 0x613   :  { %v1532_v34 = vadd.f32 %v1484_v26, %v1445_v47  ;;  %v1534_v3 = vadd.f32 %v1525_v24, %v1447_v0  ;;  %v1564_v24 = vpop.permute.xlu1 %1563 }
 0x614   :  { %v1486_v39 = vpop.f32.mrf.mxu0  ;;  %v1527_v32 = vpop.f32.mrf.mxu1 }
 0x615   :  { %v2091_v9 = vmul.f32 -1.442695, %v1532_v34  ;;  %v1533_v12 = vadd.f32 %v1486_v39, %v1446_v35  ;;  %v1535_v63 = vadd.f32 %v1527_v32, %v1448_v61 }
 0x616   :  { %v1488_v15 = vpop.f32.mrf.mxu0  ;;  %v1529_v41 = vpop.f32.mrf.mxu1 }
 0x617   :  { %2361 = vpow2.f32 %v2091_v9  ;;  %v2092_v6 = vmul.f32 -1.442695, %v1533_v12  ;;  %v2093_v46 = vmul.f32 -1.442695, %v1535_v63 }
 0x618   :  { %v1489_v55 = vpop.f32.mrf.mxu0  ;;  %v1530_v60 = vpop.f32.mrf.mxu1 }
 0x619   :  { %2363 = vpow2.f32 %v2092_v6 }
 0x61a   :  { %2365 = vtanh.f32 %v1534_v3 }
 0x61b   :  { %2367 = vpow2.f32 %v2093_v46  ;;  %v3337_v46 = vmul.f32 %v3198_v21, %v3204_v62  ;;  %v1578_v62 = vunpack.c.l.bf16 %v2884_v38 }
 0x624   :  { %v2362_v47 = vpop.eup %2361 }
 0x625   :  { %v1539_v45 = vadd.f32 1.0, %v2362_v47 }
 0x626   :  { %v2364_v26 = vpop.eup %2363 }
 0x627   :  { %2369 = vrcp.f32 %v1539_v45  ;;  %v1545_v34 = vadd.f32 1.0, %v2364_v26  ;;  %v2366_v35 = vpop.eup %2365 }
 0x628   :  { %v2368_v39 = vpop.eup %2367 }
 0x629   :  { %2371 = vrcp.f32 %v1545_v34  ;;  %v1552_v41 = vadd.f32 1.0, %v2368_v39 }
 0x62b   :  { %2373 = vrcp.f32 %v1552_v41 }
 0x634   :  { %v2370_v9 = vpop.eup %2369 }
 0x635   :  { %v1556_v12 = vmul.f32 %v2370_v9, %v2366_v35 }
 0x636   :  { %v2372_v15 = vpop.eup %2371 }
 0x637   :  { %v1555_v32 = vmul.f32 %v2372_v15, %v3202_v8 }
 0x638   :  { %v2374_v61 = vpop.eup %2373 }
 0x639   :  { %v1557_v6 = vadd.f32 %v1556_v12, %v1555_v32  ;;  %v1047_v32 = vmul.f32 %v2950_v43, %v2955_v42  ;;  %v2276_v43 = vld [vmem:[%s3464_s5 + $0x20] sm:$0xff]   ;;  %v2278_v42 = vld [vmem:[%s3464_s5 + $0x10] sm:$0xff]  }
 0x63b   :  { %2375 = vtanh.f32 %v1557_v6  ;;  %v1568_v37 = vsub.f32 %v1557_v6, %v3202_v8 }
 0x63d   :  { %v1569_v55 = vmul.f32 %v1568_v37, %v1564_v24 }
 0x63f   :  { %v3332_v60 = vadd.f32 %v1569_v55, %v3202_v8  ;;  %v2129_v55 = vpack.c.bf16 %v1047_v32, %v2894_v36  ;;  %v2277_v36 = vld [vmem:[%s3464_s5 + $0x18] sm:$0xff]  }
 0x648   :  { %v2376_v63 = vpop.eup %2375 }
 0x649   :  { %v1559_v0 = vmul.f32 %v2376_v63, %v2374_v61  ;;  %v2279_v61 = vld [vmem:[%s3464_s5 + $0x8] sm:$0xff]   ;;  %v2280_v63 = vld [vmem:[%s3464_s5] sm:$0xff]  }
 0x64b   :  { %v1560_v3 = vsub.f32 %v1559_v0, %v3210_v2  ;;  %v3339_v47 = vmul.f32 %v1564_v24, %v1559_v0  ;;  %v3480_v0 = vld [vmem:[#allocation7_spill] sm:$0xff] }
 0x64d   :  { %v1566_v45 = vmul.f32 %v1564_v24, %v1560_v3  ;;  %v2131_v26 = vpack.c.bf16 %v3339_v47, %v3337_v46  ;;  %v2274_v24 = vld [vmem:[%s3464_s5 + $0x30] sm:$0xff]   ;;  %v1707_v3 = vunpack.c.l.bf16 %v3480_v0  ;;  %v3481_v46 = vld [vmem:[#allocation8_spill] sm:$0xff] }
 0x64e   :  { %v1710_v47 = vunpack.c.h.bf16 %v3481_v46 }
 0x64f   :  { %v3344_v34 = vadd.f32 %v1566_v45, %v3210_v2 }
 0x651   :  { %v1580_v8 = vpack.c.bf16 %v3344_v34, %v3344_v34 }
 0x653   :  { %1614 = vmatmul.mubr.bf16.vlgmr.msra.gmra.mxu0 %v1580_v8  ;;  %1655 = vmatmul.mubr.bf16.vlgmr.msra.gmra.mxu1 %v1580_v8 }
 0x654   :  { %1713 = vmatpush1.bf16.msra.mxu0 %v3029_v20  ;;  %1754 = vmatpush1.bf16.msra.mxu1 %v3218_v33  ;;  %v1576_v20 = vunpack.c.l.bf16 %v2870_v52 }
 0x655   :  { %1714 = vmatprep.subr.bf16.mxu0 %v3036_v23  ;;  %1755 = vmatprep.subr.bf16.mxu1 %v3225_v51 }
 0x656   :  { %1744 = vmatprep.mubr.bf16.mxu0 %v3477_v29  ;;  %1785 = vmatprep.mubr.bf16.mxu1 %v3477_v29  ;;  %v2273_v29 = vld [vmem:[%s3464_s5 + $0x38] sm:$0xff]  }
 0x658   :  { %1715 = vmatpush1.bf16.msra.mxu0 %v3045_v5  ;;  %1756 = vmatpush1.bf16.msra.mxu1 %v3234_v4 }
 0x659   :  { %1716 = vmatprep.subr.bf16.mxu0 %v3052_v25  ;;  %1757 = vmatprep.subr.bf16.mxu1 %v3241_v7 }
 0x65c   :  { %1717 = vmatpush1.bf16.msra.mxu0 %v3059_v27  ;;  %1758 = vmatpush1.bf16.msra.mxu1 %v3248_v10  ;;  %v1577_v27 = vunpack.c.h.bf16 %v2870_v52 }
 0x65d   :  { %1718 = vmatprep.subr.bf16.mxu0 %v3066_v30  ;;  %1759 = vmatprep.subr.bf16.mxu1 %v3255_v11 }
 0x660   :  { %1719 = vmatpush1.bf16.msra.mxu0 %v3073_v31  ;;  %1760 = vmatpush1.bf16.msra.mxu1 %v3262_v14 }
 0x661   :  { %1720 = vmatprep.subr.bf16.mxu0 %v3080_v53  ;;  %1761 = vmatprep.subr.bf16.mxu1 %v3269_v16 }
 0x664   :  { %1721 = vmatpush1.bf16.msra.mxu0 %v3087_v44  ;;  %1762 = vmatpush1.bf16.msra.mxu1 %v3276_v18 }
 0x665   :  { %1722 = vmatprep.subr.bf16.mxu0 %v3094_v49  ;;  %1763 = vmatprep.subr.bf16.mxu1 %v3283_v22 }
 0x668   :  { %1723 = vmatpush1.bf16.msra.mxu0 %v3101_v40  ;;  %1764 = vmatpush1.bf16.msra.mxu1 %v3290_v58 }
 0x669   :  { %1724 = vmatprep.subr.bf16.mxu0 %v3108_v57  ;;  %1765 = vmatprep.subr.bf16.mxu1 %v3297_v13 }
 0x66c   :  { %1725 = vmatpush1.bf16.msra.mxu0 %v3115_v28  ;;  %1766 = vmatpush1.bf16.msra.mxu1 %v3304_v19  ;;  %v1695_v19 = vpop.permute.xlu0 %1694 }
 0x66d   :  { %1726 = vmatprep.subr.bf16.mxu0 %v3122_v56  ;;  %1767 = vmatprep.subr.bf16.mxu1 %v3311_v48 }
 0x670   :  { %1727 = vmatpush1.bf16.msra.mxu0 %v3186_v59  ;;  %1768 = vmatpush1.bf16.msra.mxu1 %v3318_v54  ;;  %v1579_v59 = vunpack.c.h.bf16 %v2884_v38 }
 0x671   :  { %2145 = vmatprep.subr.bf16.mxu0 %v2273_v29 }
 0x713   :  { %v1615_v23 = vpop.f32.mrf.mxu0  ;;  %v1656_v5 = vpop.f32.mrf.mxu1 }
 0x714   :  { %v1663_v25 = vadd.f32 %v1615_v23, %v1576_v20  ;;  %v1665_v2 = vadd.f32 %v1656_v5, %v1578_v62 }
 0x715   :  { %v1617_v30 = vpop.f32.mrf.mxu0  ;;  %v1658_v31 = vpop.f32.mrf.mxu1 }
 0x716   :  { %v2094_v53 = vmul.f32 -1.442695, %v1663_v25  ;;  %v1664_v44 = vadd.f32 %v1617_v30, %v1577_v27  ;;  %v1666_v21 = vadd.f32 %v1658_v31, %v1579_v59  ;;  %v1709_v31 = vunpack.c.l.bf16 %v3481_v46 }
 0x717   :  { %v1619_v49 = vpop.f32.mrf.mxu0  ;;  %v1660_v40 = vpop.f32.mrf.mxu1 }
 0x718   :  { %2377 = vpow2.f32 %v2094_v53  ;;  %v2095_v57 = vmul.f32 -1.442695, %v1664_v44  ;;  %v2096_v33 = vmul.f32 -1.442695, %v1666_v21 }
 0x719   :  { %v1620_v28 = vpop.f32.mrf.mxu0  ;;  %v1661_v56 = vpop.f32.mrf.mxu1 }
 0x71a   :  { %2379 = vpow2.f32 %v2095_v57  ;;  %v2100_v56 = vld [vmem:[%s3465_s6] ss:$0 sm:$0xff] }
 0x71b   :  { %2381 = vtanh.f32 %v1665_v2 }
 0x71c   :  { %2383 = vpow2.f32 %v2096_v33 }
 0x725   :  { %v2378_v51 = vpop.eup %2377 }
 0x726   :  { %v1670_v52 = vadd.f32 1.0, %v2378_v51 }
 0x727   :  { %v2380_v4 = vpop.eup %2379 }
 0x728   :  { %2385 = vrcp.f32 %v1670_v52  ;;  %v1676_v7 = vadd.f32 1.0, %v2380_v4  ;;  %v2382_v10 = vpop.eup %2381 }
 0x729   :  { %v2384_v11 = vpop.eup %2383 }
 0x72a   :  { %2387 = vrcp.f32 %v1676_v7  ;;  %v1683_v22 = vadd.f32 1.0, %v2384_v11 }
 0x72c   :  { %2389 = vrcp.f32 %v1683_v22 }
 0x735   :  { %v2386_v14 = vpop.eup %2385 }
 0x736   :  { %v1687_v16 = vmul.f32 %v2386_v14, %v2382_v10 }
 0x737   :  { %v2388_v18 = vpop.eup %2387 }
 0x738   :  { %v1686_v58 = vmul.f32 %v2388_v18, %v3332_v60 }
 0x739   :  { %v2390_v35 = vpop.eup %2389 }
 0x73a   :  { %v1688_v13 = vadd.f32 %v1687_v16, %v1686_v58 }
 0x73c   :  { %2391 = vtanh.f32 %v1688_v13  ;;  %v1699_v38 = vsub.f32 %v1688_v13, %v3332_v60 }
 0x73e   :  { %v1700_v48 = vmul.f32 %v1699_v38, %v1695_v19 }
 0x740   :  { %v3390_v54 = vadd.f32 %v1700_v48, %v3332_v60  ;;  %v2275_v60 = vld [vmem:[%s3464_s5 + $0x28] sm:$0xff]   ;;  %v1826_v48 = vpop.permute.xlu1 %1825 }
 0x749   :  { %v2392_v39 = vpop.eup %2391 }
 0x74a   :  { %v1690_v9 = vmul.f32 %v2392_v39, %v2390_v35 }
 0x74c   :  { %v1691_v12 = vsub.f32 %v1690_v9, %v3344_v34  ;;  %v3393_v15 = vmul.f32 %v1695_v19, %v1690_v9 }
 0x74e   :  { %v1697_v41 = vmul.f32 %v1695_v19, %v1691_v12 }
 0x750   :  { %v1698_v6 = vadd.f32 %v1697_v41, %v3344_v34 }
 0x752   :  { %v1711_v37 = vpack.c.bf16 %v1698_v6, %v1698_v6 }
 0x754   :  { %1745 = vmatmul.mubr.bf16.vlgmr.msra.gmra.mxu0 %v1711_v37  ;;  %1786 = vmatmul.mubr.bf16.vlgmr.msra.gmra.mxu1 %v1711_v37 }
 0x755   :  { %2146 = vmatpush3.bf16.msra.mxu0 %v2273_v29  ;;  %2161 = vmatprep.mubr.bf16.mxu0 %v2129_v55  ;;  %v1708_v29 = vunpack.c.h.bf16 %v3480_v0 }
 0x756   :  { %2147 = vmatprep.subr.bf16.mxu0 %v2274_v24 }
 0x759   :  { %2148 = vmatpush3.bf16.msra.mxu0 %v2274_v24 }
 0x75a   :  { %2149 = vmatprep.subr.bf16.mxu0 %v2275_v60 }
 0x75d   :  { %2150 = vmatpush3.bf16.msra.mxu0 %v2275_v60 }
 0x75e   :  { %2151 = vmatprep.subr.bf16.mxu0 %v2276_v43 }
 0x761   :  { %2152 = vmatpush3.bf16.msra.mxu0 %v2276_v43 }
 0x762   :  { %2153 = vmatprep.subr.bf16.mxu0 %v2277_v36 }
 0x765   :  { %2154 = vmatpush3.bf16.msra.mxu0 %v2277_v36 }
 0x766   :  { %2155 = vmatprep.subr.bf16.mxu0 %v2278_v42 }
 0x769   :  { %2156 = vmatpush3.bf16.msra.mxu0 %v2278_v42 }
 0x76a   :  { %2157 = vmatprep.subr.bf16.mxu0 %v2279_v61 }
 0x76d   :  { %2158 = vmatpush3.bf16.msra.mxu0 %v2279_v61 }
 0x76e   :  { %2159 = vmatprep.subr.bf16.mxu0 %v2280_v63 }
 0x771   :  { %2160 = vmatpush3.bf16.msra.mxu0 %v2280_v63 }
 0x774   :  { %2162 = vmatmul.mubr.bf16.vlgmr.msra.gmra.mxu0 %v2130_v1 }
 0x775   :  { %2165 = vmatprep.mubr.bf16.mxu0 %v2131_v26 }
 0x814   :  { %v1746_v45 = vpop.f32.mrf.mxu0  ;;  %v1787_v34 = vpop.f32.mrf.mxu1 }
 0x815   :  { %v1794_v8 = vadd.f32 %v1746_v45, %v1707_v3  ;;  %v1796_v53 = vadd.f32 %v1787_v34, %v1709_v31 }
 0x816   :  { %v1748_v20 = vpop.f32.mrf.mxu0  ;;  %v1789_v23 = vpop.f32.mrf.mxu1 }
 0x817   :  { %v2097_v5 = vmul.f32 -1.442695, %v1794_v8  ;;  %v1795_v25 = vadd.f32 %v1748_v20, %v1708_v29  ;;  %v1797_v26 = vadd.f32 %v1789_v23, %v1710_v47 }
 0x818   :  { %v1750_v27 = vpop.f32.mrf.mxu0  ;;  %v1791_v30 = vpop.f32.mrf.mxu1 }
 0x819   :  { %2393 = vpow2.f32 %v2097_v5  ;;  %v2098_v17 = vmul.f32 -1.442695, %v1795_v25  ;;  %v2099_v44 = vmul.f32 -1.442695, %v1797_v26 }
 0x81a   :  { %v1751_v50 = vpop.f32.mrf.mxu0  ;;  %v1792_v1 = vpop.f32.mrf.mxu1 }
 0x81b   :  { %2395 = vpow2.f32 %v2098_v17 }
 0x81c   :  { %2397 = vtanh.f32 %v1796_v53 }
 0x81d   :  { %2399 = vpow2.f32 %v2099_v44 }
 0x826   :  { %v2394_v49 = vpop.eup %2393 }
 0x827   :  { %v1801_v40 = vadd.f32 1.0, %v2394_v49 }
 0x828   :  { %v2396_v57 = vpop.eup %2395 }
 0x829   :  { %2401 = vrcp.f32 %v1801_v40  ;;  %v1807_v28 = vadd.f32 1.0, %v2396_v57  ;;  %v2398_v59 = vpop.eup %2397 }
 0x82a   :  { %v2400_v62 = vpop.eup %2399 }
 0x82b   :  { %2403 = vrcp.f32 %v1807_v28  ;;  %v1814_v10 = vadd.f32 1.0, %v2400_v62 }
 0x82d   :  { %2405 = vrcp.f32 %v1814_v10 }
 0x834   :  { %v2163_v21 = vpop.f32.mrf.mxu0 }
 0x835   :  { %v1956_v2 = vadd.f32 %v2163_v21, %v2100_v56 }
 0x836   :  { %v2402_v33 = vpop.eup %2401  ;;  %v1947_v51 = vpop.f32.mrf.mxu0 }
 0x837   :  { %v1818_v52 = vmul.f32 %v2402_v33, %v2398_v59  ;;  %1980 = vst [vmem:[%s3466_s7 + $0x10] sm:$0xff] %v1956_v2  ;;  %v1948_v4 = vadd.f32 %v2100_v56, %v1947_v51 }
 0x838   :  { %v2404_v7 = vpop.eup %2403  ;;  %v2164_v11 = vpop.f32.mrf.mxu0 }
 0x839   :  { %v1817_v14 = vmul.f32 %v2404_v7, %v3390_v54  ;;  %1978 = vst [vmem:[%s3466_s7] sm:$0xff] %v1948_v4  ;;  %v1959_v16 = vadd.f32 %v2164_v11, %v2100_v56 }
 0x83a   :  { %v1950_v18 = vpop.f32.mrf.mxu0  ;;  %v2406_v13 = vpop.eup %2405 }
 0x83b   :  { %v1819_v22 = vadd.f32 %v1818_v52, %v1817_v14  ;;  %1981 = vst [vmem:[%s3466_s7 + $0x18] sm:$0xff] %v1959_v16  ;;  %v1951_v58 = vadd.f32 %v2100_v56, %v1950_v18 }
 0x83d   :  { %1979 = vst [vmem:[%s3466_s7 + $0x8] sm:$0xff] %v1951_v58  ;;  %2407 = vtanh.f32 %v1819_v22 }
 0x84a   :  { %v2408_v38 = vpop.eup %2407 }
 0x84b   :  { %v1821_v19 = vmul.f32 %v2408_v38, %v2406_v13 }
 0x84d   :  { %v1833_v54 = vmul.f32 %v1826_v48, %v1821_v19 }
 0x84f   :  { %v2132_v35 = vpack.c.bf16 %v1833_v54, %v3393_v15 }
 0x851   :  { %2166 = vmatmul.mubr.bf16.gmra.mxu0 %v2132_v35 }
 0x911   :  { %v2167_v39 = vpop.f32.mrf.mxu0 }
 0x912   :  { %v1972_v9 = vadd.f32 %v2167_v39, %v2100_v56 }
 0x913   :  { %v1963_v12 = vpop.f32.mrf.mxu0 }
 0x914   :  { %1984 = vst [vmem:[%s3466_s7 + $0x30] sm:$0xff] %v1972_v9  ;;  %v1964_v41 = vadd.f32 %v2100_v56, %v1963_v12 }
 0x915   :  { %v2168_v32 = vpop.f32.mrf.mxu0 }
 0x916   :  { %1982 = vst [vmem:[%s3466_s7 + $0x20] sm:$0xff] %v1964_v41  ;;  %v1975_v6 = vadd.f32 %v2168_v32, %v2100_v56 }
 0x917   :  { %v1966_v37 = vpop.f32.mrf.mxu0 }
 0x918   :  { %1985 = vst [vmem:[%s3466_s7 + $0x38] sm:$0xff] %v1975_v6  ;;  %v1967_v15 = vadd.f32 %v2100_v56, %v1966_v37 }
 0x91a   :  { %1983 = vst [vmem:[%s3466_s7 + $0x28] sm:$0xff] %v1967_v15 }

</bundles_post_ra>
